<compile_context>
chip_gen: v6e
topology: v6e:2x2x1
jax: 0.10.0
libtpu: 0.0.40
codegen_flags: <defaults>
</compile_context>

<pallas_src>
import functools

import jax
import jax.numpy as jnp
from jax import lax
from jax.experimental import pallas as pl
from jax.experimental.pallas import tpu as pltpu


def _round_up(x, m):
    return ((x + m - 1) // m) * m


# ----------------------------------------------------------------------------
# Single fused kernel: encoder (conv3x3 + ReLU -> FC + ReLU), decoder
# (FC + sigmoid) and reward head (FC).  Everything is VMEM resident.
# ----------------------------------------------------------------------------
def _fused_fwd_kernel(p_ref, wc_ref, bc_ref, w1_ref, b1_ref, wd_ref, bd_ref,
                      wr_ref, br_ref, out_ref, rew_ref, *, batch, hid):
    """
    p_ref : (B, K_pad, H*W)   transposed, K-padded im2col patches
    wc_ref: (hid, K_pad)      conv weight, reshaped + zero-padded K
    bc_ref: (hid, 1)          conv bias
    w1_ref: (hid, H*W, Fp)    encoder FC weight (channel-major rows, feat padded)
    b1_ref: (1, Fp)           encoder FC bias (feat padded)
    wd_ref: (Fp, C*H*W)       decoder FC weight (zero rows for padded features)
    bd_ref: (1, C*H*W)        decoder FC bias
    wr_ref: (Fp, R)           reward FC weight (zero rows for padded features)
    br_ref: (1, R)            reward FC bias
    out_ref: (B, C*H*W)       lane-dense decoded observation
    rew_ref: (B, R)           predicted reward
    """
    wc = wc_ref[...]                        # (hid, Kp)
    bc = bc_ref[...]                        # (hid, 1)  -> lane broadcast
    b1 = b1_ref[...]                        # (1, Fp)

    # conv3x3 as a transposed matmul per batch element: channels land on
    # sublanes, the spatial axis (H*W) lands on lanes (lane dense).
    h_list = []
    for b in range(batch):
        h_b = jnp.dot(wc, p_ref[b], preferred_element_type=jnp.float32) + bc
        h_list.append(jnp.maximum(h_b, 0.0))                    # (hid, H*W)

    # encoder FC: contract over (channel, spatial) as `hid` small lane-dense
    # matmuls so no in-kernel reshape/relayout is needed.  Channel-major
    # accumulation order matches the PyTorch flatten order exactly.
    acc = jnp.zeros((batch, b1.shape[-1]), jnp.float32)         # (B, Fp)
    for o in range(hid):
        lhs_o = jnp.concatenate([h[o:o + 1, :] for h in h_list], axis=0)  # (B, H*W)
        acc = acc + jnp.dot(lhs_o, w1_ref[o], preferred_element_type=jnp.float32)
    latents = jnp.maximum(acc + b1, 0.0)                         # (B, Fp)

    # decoder FC + sigmoid -> lane-dense (B, C*H*W) output.
    dec = jnp.dot(latents, wd_ref[...], preferred_element_type=jnp.float32) + bd_ref[...]
    out_ref[...] = jax.nn.sigmoid(dec).astype(out_ref.dtype)

    # reward head.
    rew = jnp.dot(latents, wr_ref[...], preferred_element_type=jnp.float32) + br_ref[...]
    rew_ref[...] = rew.astype(rew_ref.dtype)


# ----------------------------------------------------------------------------
# AutoEncoderEnvironmentModel with a synthetic conv+FC encoder / FC decoder.
# TODO(synk): the PyTorch module takes arbitrary encoder/decoder submodules;
#             a concrete conv3x3+FC encoder and FC decoder are synthesized here.
# ----------------------------------------------------------------------------
class AutoEncoderEnvironmentModelPallas:
    def __init__(self, observation_shape, num_actions, reward_size,
                 hidden_ch=8, feat_dim=32, key=jax.random.PRNGKey(0)):
        C, H, W = observation_shape
        self.observation_shape = observation_shape
        self.num_actions = num_actions
        self.reward_size = reward_size
        self.hidden_ch = hidden_ch
        self.feat_dim = feat_dim

        def uinit(k, shape, fan_in):
            lim = 1.0 / jnp.sqrt(jnp.float32(fan_in))
            return jax.random.uniform(k, shape, jnp.float32, -lim, lim)

        ks = jax.random.split(key, 8)
        cin = C + num_actions
        # canonical (PyTorch-layout) parameters -- used by the reference.
        self.conv_w = uinit(ks[0], (hidden_ch, cin, 3, 3), cin * 9)
        self.conv_b = uinit(ks[1], (hidden_ch,), cin * 9)
        self.fc1_w = uinit(ks[2], (hidden_ch * H * W, feat_dim), hidden_ch * H * W)
        self.fc1_b = uinit(ks[3], (feat_dim,), hidden_ch * H * W)
        self.dec_w = uinit(ks[4], (feat_dim, C * H * W), feat_dim)
        self.dec_b = uinit(ks[5], (C * H * W,), feat_dim)
        self.rew_w = uinit(ks[6], (feat_dim, reward_size), feat_dim)
        self.rew_b = uinit(ks[7], (reward_size,), feat_dim)

        # kernel-side copies: transposed / zero-padded once at init (free, exact).
        kc = cin * 9
        self._hw = H * W
        self._chw = C * H * W
        self._k_pad = _round_up(kc, 128)            # 90  -> 128 aligned contraction
        self._feat_pad = _round_up(feat_dim, 128)   # 32  -> 128 lane-dense latent
        self._wc_p = jnp.pad(self.conv_w.reshape(hidden_ch, kc),
                             ((0, 0), (0, self._k_pad - kc)))
        self._bc_p = self.conv_b.reshape(hidden_ch, 1)
        self._w1_p = jnp.pad(self.fc1_w.reshape(hidden_ch, self._hw, feat_dim),
                             ((0, 0), (0, 0), (0, self._feat_pad - feat_dim)))
        self._b1_p = jnp.pad(self.fc1_b.reshape(1, feat_dim),
                             ((0, 0), (0, self._feat_pad - feat_dim)))
        self._wd_p = jnp.pad(self.dec_w, ((0, self._feat_pad - feat_dim), (0, 0)))
        self._bd_p = self.dec_b.reshape(1, self._chw)
        self._wr_p = jnp.pad(self.rew_w, ((0, self._feat_pad - feat_dim), (0, 0)))
        self._br_p = self.rew_b.reshape(1, reward_size)

    def get_feature_shape(self):
        return self.feat_dim

    def _im2col_t(self, x):
        """x: (B, Cin, H, W) NCHW -> transposed patches (B, K_pad, H*W).

        Built entirely with pads / static slices / stack / reshape: no
        NCHW<->NHWC transposes.  Row order k = c*9 + dy*3 + dx matches
        conv_w.reshape(Cout, Cin*9)."""
        B, Cin, H, W = x.shape
        kc = Cin * 9
        xp = jnp.pad(x, ((0, 0), (0, 0), (1, 1), (1, 1)))
        taps = [xp[:, :, dy:dy + H, dx:dx + W]
                for dy in range(3) for dx in range(3)]            # 9 x (B,Cin,H,W)
        pt = jnp.stack(taps, axis=2).reshape(B, kc, H * W)        # (B, Cin*9, H*W)
        return jnp.pad(pt, ((0, 0), (0, self._k_pad - kc), (0, 0)))

    def __call__(self, observations, actions):
        """observations: (B, C, H, W) float32, actions: (B, 1) int."""
        B, C, H, W = observations.shape
        A = self.num_actions
        actions = actions.astype(jnp.int32)

        # Reproduces PyTorch `onehot_actions[range(B), actions] = 1` with
        # actions of shape (B, 1): advanced-index broadcasting sets
        # onehot[j, actions[i]] = 1 for ALL i, j — every row receives the
        # union of actions present in the batch.
        present = jnp.any(
            actions == jnp.arange(A, dtype=jnp.int32)[None, :], axis=0)   # (A,)
        onehot = jnp.broadcast_to(
            present.astype(observations.dtype)[None, :, None, None],
            (B, A, H, W))

        inputs = jnp.concatenate([observations, onehot], axis=1)          # (B, C+A, H, W)
        patches_t = self._im2col_t(inputs)                                # (B, Kp, H*W)

        kernel = functools.partial(_fused_fwd_kernel, batch=B, hid=self.hidden_ch)
        vmem = pl.BlockSpec(memory_space=pltpu.MemorySpace.VMEM)
        out_flat, reward = pl.pallas_call(
            kernel,
            out_shape=(jax.ShapeDtypeStruct((B, self._chw), jnp.float32),
                       jax.ShapeDtypeStruct((B, self.reward_size), jnp.float32)),
            in_specs=[vmem] * 9,
            out_specs=(vmem, vmem),
        )(patches_t, self._wc_p, self._bc_p, self._w1_p, self._b1_p,
          self._wd_p, self._bd_p, self._wr_p, self._br_p)

        output = out_flat.reshape(B, C, H, W)
        return output, reward


# ----------------------------------------------------------------------------
# Plain-JAX reference (canonical NCHW layout) for a correctness sanity check.
# ----------------------------------------------------------------------------
def _reference_forward(model, observations, actions):
    B, C, H, W = observations.shape
    actions = actions.astype(jnp.int32)
    present = jnp.any(actions == jnp.arange(model.num_actions)[None, :], axis=0)
    onehot = jnp.broadcast_to(
        present.astype(observations.dtype)[None, :, None, None],
        (B, model.num_actions, H, W))
    inputs = jnp.concatenate([observations, onehot], axis=1)
    h = lax.conv_general_dilated(
        inputs, model.conv_w, (1, 1), [(1, 1), (1, 1)],
        dimension_numbers=("NCHW", "OIHW", "NCHW"))
    h = jnp.maximum(h + model.conv_b[None, :, None, None], 0.0)
    h = h.reshape(B, -1)                                   # channel-major flatten
    latents = jnp.maximum(h @ model.fc1_w + model.fc1_b, 0.0)
    output = jax.nn.sigmoid(latents @ model.dec_w + model.dec_b).reshape(B, C, H, W)
    reward = latents @ model.rew_w + model.rew_b
    return output, reward


if __name__ == "__main__":
    B, C, H, W = 2, 4, 16, 16
    num_actions, reward_size = 6, 1

    key = jax.random.PRNGKey(0)
    k_obs, k_act, k_par = jax.random.split(key, 3)
    observations = jax.random.normal(k_obs, (B, C, H, W), jnp.float32)
    actions = jax.random.randint(k_act, (B, 1), 0, num_actions)

    model = AutoEncoderEnvironmentModelPallas(
        (C, H, W), num_actions, reward_size, key=k_par)

    output, reward = jax.jit(model.__call__)(observations, actions)
    jax.block_until_ready((output, reward))

    out_ref, rew_ref = _reference_forward(model, observations, actions)
    assert output.shape == (B, C, H, W) and reward.shape == (B, reward_size)
    assert jnp.allclose(output, out_ref, atol=2e-4, rtol=2e-4)
    assert jnp.allclose(reward, rew_ref, atol=2e-4, rtol=2e-4)

    print("KERNEL_OK")
</pallas_src>

<mosaic_0001>
module attributes {stable_mosaic.version = 11 : i64} {
  func.func @_fused_fwd_kernel(%arg0: memref<2x128x256xf32, #tpu.memory_space<vmem>>, %arg1: memref<8x128xf32, #tpu.memory_space<vmem>>, %arg2: memref<8x1xf32, #tpu.memory_space<vmem>>, %arg3: memref<8x256x128xf32, #tpu.memory_space<vmem>>, %arg4: memref<1x128xf32, #tpu.memory_space<vmem>>, %arg5: memref<128x1024xf32, #tpu.memory_space<vmem>>, %arg6: memref<1x1024xf32, #tpu.memory_space<vmem>>, %arg7: memref<128x1xf32, #tpu.memory_space<vmem>>, %arg8: memref<1x1xf32, #tpu.memory_space<vmem>>, %arg9: memref<2x1024xf32, #tpu.memory_space<vmem>>, %arg10: memref<2x1xf32, #tpu.memory_space<vmem>>) attributes {dimension_semantics = [], scalar_prefetch = 0 : i64, scratch_operands = 0 : i64, tpu.core_type = #tpu.core_type<tc>} {
    %c0 = arith.constant 0 : index
    %c0_0 = arith.constant 0 : index
    %0 = vector.load %arg1[%c0, %c0_0] : memref<8x128xf32, #tpu.memory_space<vmem>>, vector<8x128xf32>
    %c0_1 = arith.constant 0 : index
    %c0_2 = arith.constant 0 : index
    %1 = vector.load %arg2[%c0_1, %c0_2] : memref<8x1xf32, #tpu.memory_space<vmem>>, vector<8x1xf32>
    %c0_3 = arith.constant 0 : index
    %c0_4 = arith.constant 0 : index
    %2 = vector.load %arg4[%c0_3, %c0_4] : memref<1x128xf32, #tpu.memory_space<vmem>>, vector<1x128xf32>
    %c0_5 = arith.constant 0 : index
    %c0_6 = arith.constant 0 : index
    %c0_7 = arith.constant 0 : index
    %3 = vector.load %arg0[%c0_5, %c0_6, %c0_7] : memref<2x128x256xf32, #tpu.memory_space<vmem>>, vector<1x128x256xf32>
    %4 = vector.shape_cast %3 : vector<1x128x256xf32> to vector<128x256xf32>
    %cst = arith.constant dense<0.000000e+00> : vector<8x256xf32>
    %5 = tpu.matmul %0, %4, %cst {dimension_numbers = #tpu.dot_dimension_numbers<[1], [0], [0], [1], [0, 0, 1, 1], [], []>} : vector<8x128xf32>, vector<128x256xf32>, vector<8x256xf32> -> vector<8x256xf32>
    %6 = vector.broadcast %1 : vector<8x1xf32> to vector<8x256xf32>
    %7 = arith.addf %5, %6 : vector<8x256xf32>
    %cst_8 = arith.constant 0.000000e+00 : f32
    %8 = vector.broadcast %cst_8 : f32 to vector<8x256xf32>
    %9 = arith.maximumf %7, %8 : vector<8x256xf32>
    %c1 = arith.constant 1 : index
    %c0_9 = arith.constant 0 : index
    %c0_10 = arith.constant 0 : index
    %10 = vector.load %arg0[%c1, %c0_9, %c0_10] : memref<2x128x256xf32, #tpu.memory_space<vmem>>, vector<1x128x256xf32>
    %11 = vector.shape_cast %10 : vector<1x128x256xf32> to vector<128x256xf32>
    %cst_11 = arith.constant dense<0.000000e+00> : vector<8x256xf32>
    %12 = tpu.matmul %0, %11, %cst_11 {dimension_numbers = #tpu.dot_dimension_numbers<[1], [0], [0], [1], [0, 0, 1, 1], [], []>} : vector<8x128xf32>, vector<128x256xf32>, vector<8x256xf32> -> vector<8x256xf32>
    %13 = vector.broadcast %1 : vector<8x1xf32> to vector<8x256xf32>
    %14 = arith.addf %12, %13 : vector<8x256xf32>
    %cst_12 = arith.constant 0.000000e+00 : f32
    %15 = vector.broadcast %cst_12 : f32 to vector<8x256xf32>
    %16 = arith.maximumf %14, %15 : vector<8x256xf32>
    %cst_13 = arith.constant 0.000000e+00 : f32
    %17 = vector.broadcast %cst_13 : f32 to vector<2x128xf32>
    %18 = vector.extract_strided_slice %9 {offsets = [0, 0], sizes = [1, 256], strides = [1, 1]} : vector<8x256xf32> to vector<1x256xf32>
    %19 = vector.extract_strided_slice %16 {offsets = [0, 0], sizes = [1, 256], strides = [1, 1]} : vector<8x256xf32> to vector<1x256xf32>
    %20 = tpu.concatenate %18, %19 in 0 : vector<1x256xf32>, vector<1x256xf32> -> vector<2x256xf32>
    %c0_14 = arith.constant 0 : index
    %c0_15 = arith.constant 0 : index
    %c0_16 = arith.constant 0 : index
    %21 = vector.load %arg3[%c0_14, %c0_15, %c0_16] : memref<8x256x128xf32, #tpu.memory_space<vmem>>, vector<1x256x128xf32>
    %22 = vector.shape_cast %21 : vector<1x256x128xf32> to vector<256x128xf32>
    %cst_17 = arith.constant dense<0.000000e+00> : vector<2x128xf32>
    %23 = tpu.matmul %20, %22, %cst_17 {dimension_numbers = #tpu.dot_dimension_numbers<[1], [0], [0], [1], [0, 0, 1, 1], [], []>} : vector<2x256xf32>, vector<256x128xf32>, vector<2x128xf32> -> vector<2x128xf32>
    %24 = arith.addf %17, %23 : vector<2x128xf32>
    %25 = vector.extract_strided_slice %9 {offsets = [1, 0], sizes = [1, 256], strides = [1, 1]} : vector<8x256xf32> to vector<1x256xf32>
    %26 = vector.extract_strided_slice %16 {offsets = [1, 0], sizes = [1, 256], strides = [1, 1]} : vector<8x256xf32> to vector<1x256xf32>
    %27 = tpu.concatenate %25, %26 in 0 : vector<1x256xf32>, vector<1x256xf32> -> vector<2x256xf32>
    %c1_18 = arith.constant 1 : index
    %c0_19 = arith.constant 0 : index
    %c0_20 = arith.constant 0 : index
    %28 = vector.load %arg3[%c1_18, %c0_19, %c0_20] : memref<8x256x128xf32, #tpu.memory_space<vmem>>, vector<1x256x128xf32>
    %29 = vector.shape_cast %28 : vector<1x256x128xf32> to vector<256x128xf32>
    %cst_21 = arith.constant dense<0.000000e+00> : vector<2x128xf32>
    %30 = tpu.matmul %27, %29, %cst_21 {dimension_numbers = #tpu.dot_dimension_numbers<[1], [0], [0], [1], [0, 0, 1, 1], [], []>} : vector<2x256xf32>, vector<256x128xf32>, vector<2x128xf32> -> vector<2x128xf32>
    %31 = arith.addf %24, %30 : vector<2x128xf32>
    %32 = vector.extract_strided_slice %9 {offsets = [2, 0], sizes = [1, 256], strides = [1, 1]} : vector<8x256xf32> to vector<1x256xf32>
    %33 = vector.extract_strided_slice %16 {offsets = [2, 0], sizes = [1, 256], strides = [1, 1]} : vector<8x256xf32> to vector<1x256xf32>
    %34 = tpu.concatenate %32, %33 in 0 : vector<1x256xf32>, vector<1x256xf32> -> vector<2x256xf32>
    %c2 = arith.constant 2 : index
    %c0_22 = arith.constant 0 : index
    %c0_23 = arith.constant 0 : index
    %35 = vector.load %arg3[%c2, %c0_22, %c0_23] : memref<8x256x128xf32, #tpu.memory_space<vmem>>, vector<1x256x128xf32>
    %36 = vector.shape_cast %35 : vector<1x256x128xf32> to vector<256x128xf32>
    %cst_24 = arith.constant dense<0.000000e+00> : vector<2x128xf32>
    %37 = tpu.matmul %34, %36, %cst_24 {dimension_numbers = #tpu.dot_dimension_numbers<[1], [0], [0], [1], [0, 0, 1, 1], [], []>} : vector<2x256xf32>, vector<256x128xf32>, vector<2x128xf32> -> vector<2x128xf32>
    %38 = arith.addf %31, %37 : vector<2x128xf32>
    %39 = vector.extract_strided_slice %9 {offsets = [3, 0], sizes = [1, 256], strides = [1, 1]} : vector<8x256xf32> to vector<1x256xf32>
    %40 = vector.extract_strided_slice %16 {offsets = [3, 0], sizes = [1, 256], strides = [1, 1]} : vector<8x256xf32> to vector<1x256xf32>
    %41 = tpu.concatenate %39, %40 in 0 : vector<1x256xf32>, vector<1x256xf32> -> vector<2x256xf32>
    %c3 = arith.constant 3 : index
    %c0_25 = arith.constant 0 : index
    %c0_26 = arith.constant 0 : index
    %42 = vector.load %arg3[%c3, %c0_25, %c0_26] : memref<8x256x128xf32, #tpu.memory_space<vmem>>, vector<1x256x128xf32>
    %43 = vector.shape_cast %42 : vector<1x256x128xf32> to vector<256x128xf32>
    %cst_27 = arith.constant dense<0.000000e+00> : vector<2x128xf32>
    %44 = tpu.matmul %41, %43, %cst_27 {dimension_numbers = #tpu.dot_dimension_numbers<[1], [0], [0], [1], [0, 0, 1, 1], [], []>} : vector<2x256xf32>, vector<256x128xf32>, vector<2x128xf32> -> vector<2x128xf32>
    %45 = arith.addf %38, %44 : vector<2x128xf32>
    %46 = vector.extract_strided_slice %9 {offsets = [4, 0], sizes = [1, 256], strides = [1, 1]} : vector<8x256xf32> to vector<1x256xf32>
    %47 = vector.extract_strided_slice %16 {offsets = [4, 0], sizes = [1, 256], strides = [1, 1]} : vector<8x256xf32> to vector<1x256xf32>
    %48 = tpu.concatenate %46, %47 in 0 : vector<1x256xf32>, vector<1x256xf32> -> vector<2x256xf32>
    %c4 = arith.constant 4 : index
    %c0_28 = arith.constant 0 : index
    %c0_29 = arith.constant 0 : index
    %49 = vector.load %arg3[%c4, %c0_28, %c0_29] : memref<8x256x128xf32, #tpu.memory_space<vmem>>, vector<1x256x128xf32>
    %50 = vector.shape_cast %49 : vector<1x256x128xf32> to vector<256x128xf32>
    %cst_30 = arith.constant dense<0.000000e+00> : vector<2x128xf32>
    %51 = tpu.matmul %48, %50, %cst_30 {dimension_numbers = #tpu.dot_dimension_numbers<[1], [0], [0], [1], [0, 0, 1, 1], [], []>} : vector<2x256xf32>, vector<256x128xf32>, vector<2x128xf32> -> vector<2x128xf32>
    %52 = arith.addf %45, %51 : vector<2x128xf32>
    %53 = vector.extract_strided_slice %9 {offsets = [5, 0], sizes = [1, 256], strides = [1, 1]} : vector<8x256xf32> to vector<1x256xf32>
    %54 = vector.extract_strided_slice %16 {offsets = [5, 0], sizes = [1, 256], strides = [1, 1]} : vector<8x256xf32> to vector<1x256xf32>
    %55 = tpu.concatenate %53, %54 in 0 : vector<1x256xf32>, vector<1x256xf32> -> vector<2x256xf32>
    %c5 = arith.constant 5 : index
    %c0_31 = arith.constant 0 : index
    %c0_32 = arith.constant 0 : index
    %56 = vector.load %arg3[%c5, %c0_31, %c0_32] : memref<8x256x128xf32, #tpu.memory_space<vmem>>, vector<1x256x128xf32>
    %57 = vector.shape_cast %56 : vector<1x256x128xf32> to vector<256x128xf32>
    %cst_33 = arith.constant dense<0.000000e+00> : vector<2x128xf32>
    %58 = tpu.matmul %55, %57, %cst_33 {dimension_numbers = #tpu.dot_dimension_numbers<[1], [0], [0], [1], [0, 0, 1, 1], [], []>} : vector<2x256xf32>, vector<256x128xf32>, vector<2x128xf32> -> vector<2x128xf32>
    %59 = arith.addf %52, %58 : vector<2x128xf32>
    %60 = vector.extract_strided_slice %9 {offsets = [6, 0], sizes = [1, 256], strides = [1, 1]} : vector<8x256xf32> to vector<1x256xf32>
    %61 = vector.extract_strided_slice %16 {offsets = [6, 0], sizes = [1, 256], strides = [1, 1]} : vector<8x256xf32> to vector<1x256xf32>
    %62 = tpu.concatenate %60, %61 in 0 : vector<1x256xf32>, vector<1x256xf32> -> vector<2x256xf32>
    %c6 = arith.constant 6 : index
    %c0_34 = arith.constant 0 : index
    %c0_35 = arith.constant 0 : index
    %63 = vector.load %arg3[%c6, %c0_34, %c0_35] : memref<8x256x128xf32, #tpu.memory_space<vmem>>, vector<1x256x128xf32>
    %64 = vector.shape_cast %63 : vector<1x256x128xf32> to vector<256x128xf32>
    %cst_36 = arith.constant dense<0.000000e+00> : vector<2x128xf32>
    %65 = tpu.matmul %62, %64, %cst_36 {dimension_numbers = #tpu.dot_dimension_numbers<[1], [0], [0], [1], [0, 0, 1, 1], [], []>} : vector<2x256xf32>, vector<256x128xf32>, vector<2x128xf32> -> vector<2x128xf32>
    %66 = arith.addf %59, %65 : vector<2x128xf32>
    %67 = vector.extract_strided_slice %9 {offsets = [7, 0], sizes = [1, 256], strides = [1, 1]} : vector<8x256xf32> to vector<1x256xf32>
    %68 = vector.extract_strided_slice %16 {offsets = [7, 0], sizes = [1, 256], strides = [1, 1]} : vector<8x256xf32> to vector<1x256xf32>
    %69 = tpu.concatenate %67, %68 in 0 : vector<1x256xf32>, vector<1x256xf32> -> vector<2x256xf32>
    %c7 = arith.constant 7 : index
    %c0_37 = arith.constant 0 : index
    %c0_38 = arith.constant 0 : index
    %70 = vector.load %arg3[%c7, %c0_37, %c0_38] : memref<8x256x128xf32, #tpu.memory_space<vmem>>, vector<1x256x128xf32>
    %71 = vector.shape_cast %70 : vector<1x256x128xf32> to vector<256x128xf32>
    %cst_39 = arith.constant dense<0.000000e+00> : vector<2x128xf32>
    %72 = tpu.matmul %69, %71, %cst_39 {dimension_numbers = #tpu.dot_dimension_numbers<[1], [0], [0], [1], [0, 0, 1, 1], [], []>} : vector<2x256xf32>, vector<256x128xf32>, vector<2x128xf32> -> vector<2x128xf32>
    %73 = arith.addf %66, %72 : vector<2x128xf32>
    %74 = vector.broadcast %2 : vector<1x128xf32> to vector<2x128xf32>
    %75 = arith.addf %73, %74 : vector<2x128xf32>
    %cst_40 = arith.constant 0.000000e+00 : f32
    %76 = vector.broadcast %cst_40 : f32 to vector<2x128xf32>
    %77 = arith.maximumf %75, %76 : vector<2x128xf32>
    %c0_41 = arith.constant 0 : index
    %c0_42 = arith.constant 0 : index
    %78 = vector.load %arg5[%c0_41, %c0_42] : memref<128x1024xf32, #tpu.memory_space<vmem>>, vector<128x1024xf32>
    %cst_43 = arith.constant dense<0.000000e+00> : vector<2x1024xf32>
    %79 = tpu.matmul %77, %78, %cst_43 {dimension_numbers = #tpu.dot_dimension_numbers<[1], [0], [0], [1], [0, 0, 1, 1], [], []>} : vector<2x128xf32>, vector<128x1024xf32>, vector<2x1024xf32> -> vector<2x1024xf32>
    %c0_44 = arith.constant 0 : index
    %c0_45 = arith.constant 0 : index
    %80 = vector.load %arg6[%c0_44, %c0_45] : memref<1x1024xf32, #tpu.memory_space<vmem>>, vector<1x1024xf32>
    %81 = vector.broadcast %80 : vector<1x1024xf32> to vector<2x1024xf32>
    %82 = arith.addf %79, %81 : vector<2x1024xf32>
    %83 = arith.negf %82 : vector<2x1024xf32>
    %84 = math.exp %83 : vector<2x1024xf32>
    %cst_46 = arith.constant 1.000000e+00 : f32
    %85 = vector.broadcast %cst_46 : f32 to vector<2x1024xf32>
    %86 = arith.addf %85, %84 : vector<2x1024xf32>
    %87 = arith.divf %85, %86 : vector<2x1024xf32>
    %c0_47 = arith.constant 0 : index
    %c0_48 = arith.constant 0 : index
    %88 = vector.load %arg9[%c0_47, %c0_48] : memref<2x1024xf32, #tpu.memory_space<vmem>>, vector<2x1024xf32>
    tpu.vector_store %arg9[%c0_47, %c0_48], %87 {strides = array<i32>} : memref<2x1024xf32, #tpu.memory_space<vmem>>, vector<2x1024xf32>,
    %c0_49 = arith.constant 0 : index
    %c0_50 = arith.constant 0 : index
    %89 = vector.load %arg7[%c0_49, %c0_50] : memref<128x1xf32, #tpu.memory_space<vmem>>, vector<128x1xf32>
    %cst_51 = arith.constant dense<0.000000e+00> : vector<2x1xf32>
    %90 = tpu.matmul %77, %89, %cst_51 {dimension_numbers = #tpu.dot_dimension_numbers<[1], [0], [0], [1], [0, 0, 1, 1], [], []>} : vector<2x128xf32>, vector<128x1xf32>, vector<2x1xf32> -> vector<2x1xf32>
    %c0_52 = arith.constant 0 : index
    %c0_53 = arith.constant 0 : index
    %91 = vector.load %arg8[%c0_52, %c0_53] : memref<1x1xf32, #tpu.memory_space<vmem>>, vector<1x1xf32>
    %92 = vector.broadcast %91 : vector<1x1xf32> to vector<2x1xf32>
    %93 = arith.addf %90, %92 : vector<2x1xf32>
    %c0_54 = arith.constant 0 : index
    %c0_55 = arith.constant 0 : index
    %94 = vector.load %arg10[%c0_54, %c0_55] : memref<2x1xf32, #tpu.memory_space<vmem>>, vector<2x1xf32>
    tpu.vector_store %arg10[%c0_54, %c0_55], %93 {strides = array<i32>} : memref<2x1xf32, #tpu.memory_space<vmem>>, vector<2x1xf32>,
    return
  }
}

</mosaic_0001>

<bundles_post_ra>
// kernel: a_call__.1
= control target key start
LH: loop header
LB: loop body
LE: loop exit
PB: predicated region body
PF: predicated region fallthrough
CT: control target
= control target key end

     0   :  { %v2455_v3 = vmov 0.0   ;;  %vm261_vm0 = vcmask 1040384   ;;  %vm2457_vm1 = vmmov 0   ;;  %vm1810_vm2 = vcmask 1024   ;;  %s4034_s0 = inlined_call_operand.vmem [shape: f32[2,128,256], index: 0, kind: input, shape index: {}]   ;;  %s4035_s1 = inlined_call_operand.vmem [shape: f32[8,128], index: 1, kind: input, shape index: {}]   ;;  %s4036_s3 = inlined_call_operand.vmem [shape: f32[8,256,128], index: 3, kind: input, shape index: {}]   ;;  %s4037_s2 = inlined_call_operand.vmem [shape: f32[8,1], index: 2, kind: input, shape index: {}]   ;;  %s4038_s5 = inlined_call_operand.vmem [shape: f32[128,1024], index: 5, kind: input, shape index: {}]   ;;  %s4039_s4 = inlined_call_operand.vmem [shape: f32[1,128], index: 4, kind: input, shape index: {}]   ;;  %s4040_s7 = inlined_call_operand.vmem [shape: f32[128,1], index: 7, kind: input, shape index: {}]   ;;  %s4041_s8 = inlined_call_operand.<no memory space> [shape: f32[1,1], index: 8, kind: input, shape index: {}]   ;;  %s4042_s6 = inlined_call_operand.vmem [shape: f32[1,1024], index: 6, kind: input, shape index: {}]   ;;  %s4043_s9 = inlined_call_operand.vmem [shape: f32[2,1024], index: 9, kind: output, shape index: {0}]   ;;  %s4044_s10 = inlined_call_operand.vmem [shape: f32[2,1], index: 10, kind: output, shape index: {1}]  }
   0x1   :  { %v70_v0 = vld [vmem:[%s4034_s0 + $0xf8] sm:$0xff]  ;;  %v69_v2 = vld [vmem:[%s4034_s0 + $0xf0] sm:$0xff]  ;;  %140 = vmatprep.mubr.f32.mxu0 %v2455_v3  ;;  %246 = vmatprep.mubr.f32.mxu1 %v2455_v3  ;;  %v68_v5 = vld [vmem:[%s4034_s0 + $0xe8] sm:$0xff] }
   0x2   :  { %v1851_v1 = vld [vmem:[%s4034_s0 + $0x1f8] sm:$0xff]  ;;  %76 = vmatprep.subr.mxu0 %v70_v0  ;;  %v1850_v4 = vld [vmem:[%s4034_s0 + $0x1f0] sm:$0xff]  ;;  %v1849_v6 = vld [vmem:[%s4034_s0 + $0x1e8] sm:$0xff] }
   0x3   :  { %182 = vmatprep.subr.mxu1 %v1851_v1  ;;  %77 = vmatpush1.msra.mxu0 %v69_v2  ;;  %v67_v7 = vld [vmem:[%s4034_s0 + $0xe0] sm:$0xff]  ;;  %v66_v9 = vld [vmem:[%s4034_s0 + $0xd8] sm:$0xff]  ;;  %v65_v11 = vld [vmem:[%s4034_s0 + $0xd0] sm:$0xff] }
   0x4   :  { %183 = vmatpush1.msra.mxu1 %v1850_v4  ;;  %v1848_v8 = vld [vmem:[%s4034_s0 + $0x1e0] sm:$0xff]  ;;  %78 = vmatprep.subr.mxu0 %v68_v5  ;;  %v1847_v10 = vld [vmem:[%s4034_s0 + $0x1d8] sm:$0xff]  ;;  %v1846_v12 = vld [vmem:[%s4034_s0 + $0x1d0] sm:$0xff] }
   0x5   :  { %184 = vmatprep.subr.mxu1 %v1849_v6  ;;  %79 = vmatpush1.msra.mxu0 %v67_v7  ;;  %v64_v13 = vld [vmem:[%s4034_s0 + $0xc8] sm:$0xff]  ;;  %v63_v15 = vld [vmem:[%s4034_s0 + $0xc0] sm:$0xff]  ;;  %v62_v17 = vld [vmem:[%s4034_s0 + $0xb8] sm:$0xff] }
   0x6   :  { %185 = vmatpush1.msra.mxu1 %v1848_v8  ;;  %v1845_v14 = vld [vmem:[%s4034_s0 + $0x1c8] sm:$0xff]  ;;  %80 = vmatprep.subr.mxu0 %v66_v9  ;;  %v1844_v16 = vld [vmem:[%s4034_s0 + $0x1c0] sm:$0xff]  ;;  %v1843_v18 = vld [vmem:[%s4034_s0 + $0x1b8] sm:$0xff]  ;;  %v2456_v8 = vmov 0  }
   0x7   :  { %186 = vmatprep.subr.mxu1 %v1847_v10  ;;  %81 = vmatpush1.msra.mxu0 %v65_v11  ;;  %v61_v19 = vld [vmem:[%s4034_s0 + $0xb0] sm:$0xff]  ;;  %v60_v21 = vld [vmem:[%s4034_s0 + $0xa8] sm:$0xff]  ;;  %v59_v23 = vld [vmem:[%s4034_s0 + $0xa0] sm:$0xff] }
   0x8   :  { %187 = vmatpush1.msra.mxu1 %v1846_v12  ;;  %82 = vmatprep.subr.mxu0 %v64_v13  ;;  %v1842_v20 = vld [vmem:[%s4034_s0 + $0x1b0] sm:$0xff]  ;;  %v1841_v22 = vld [vmem:[%s4034_s0 + $0x1a8] sm:$0xff]  ;;  %v1840_v24 = vld [vmem:[%s4034_s0 + $0x1a0] sm:$0xff] }
   0x9   :  { %188 = vmatprep.subr.mxu1 %v1845_v14  ;;  %83 = vmatpush1.msra.mxu0 %v63_v15  ;;  %v58_v25 = vld [vmem:[%s4034_s0 + $0x98] sm:$0xff]  ;;  %v57_v27 = vld [vmem:[%s4034_s0 + $0x90] sm:$0xff]  ;;  %v56_v29 = vld [vmem:[%s4034_s0 + $0x88] sm:$0xff] }
   0xa   :  { %189 = vmatpush1.msra.mxu1 %v1844_v16  ;;  %84 = vmatprep.subr.mxu0 %v62_v17  ;;  %v1839_v26 = vld [vmem:[%s4034_s0 + $0x198] sm:$0xff]  ;;  %v1838_v28 = vld [vmem:[%s4034_s0 + $0x190] sm:$0xff]  ;;  %v1837_v30 = vld [vmem:[%s4034_s0 + $0x188] sm:$0xff] }
   0xb   :  { %190 = vmatprep.subr.mxu1 %v1843_v18  ;;  %85 = vmatpush1.msra.mxu0 %v61_v19  ;;  %v55_v31 = vld [vmem:[%s4034_s0 + $0x80] sm:$0xff]  ;;  %v54_v33 = vld [vmem:[%s4034_s0 + $0x78] sm:$0xff]  ;;  %v53_v35 = vld [vmem:[%s4034_s0 + $0x70] sm:$0xff] }
   0xc   :  { %191 = vmatpush1.msra.mxu1 %v1842_v20  ;;  %86 = vmatprep.subr.mxu0 %v60_v21  ;;  %v1836_v32 = vld [vmem:[%s4034_s0 + $0x180] sm:$0xff]  ;;  %v1835_v34 = vld [vmem:[%s4034_s0 + $0x178] sm:$0xff]  ;;  %v1834_v36 = vld [vmem:[%s4034_s0 + $0x170] sm:$0xff] }
   0xd   :  { %192 = vmatprep.subr.mxu1 %v1841_v22  ;;  %87 = vmatpush1.msra.mxu0 %v59_v23  ;;  %v52_v37 = vld [vmem:[%s4034_s0 + $0x68] sm:$0xff]  ;;  %v51_v39 = vld [vmem:[%s4034_s0 + $0x60] sm:$0xff]  ;;  %v50_v41 = vld [vmem:[%s4034_s0 + $0x58] sm:$0xff] }
   0xe   :  { %193 = vmatpush1.msra.mxu1 %v1840_v24  ;;  %88 = vmatprep.subr.mxu0 %v58_v25  ;;  %v1833_v38 = vld [vmem:[%s4034_s0 + $0x168] sm:$0xff]  ;;  %v1832_v40 = vld [vmem:[%s4034_s0 + $0x160] sm:$0xff]  ;;  %v1831_v42 = vld [vmem:[%s4034_s0 + $0x158] sm:$0xff] }
   0xf   :  { %194 = vmatprep.subr.mxu1 %v1839_v26  ;;  %89 = vmatpush1.msra.mxu0 %v57_v27  ;;  %v49_v43 = vld [vmem:[%s4034_s0 + $0x50] sm:$0xff]  ;;  %v48_v45 = vld [vmem:[%s4034_s0 + $0x48] sm:$0xff]  ;;  %v47_v47 = vld [vmem:[%s4034_s0 + $0x40] sm:$0xff] }
  0x10   :  { %195 = vmatpush1.msra.mxu1 %v1838_v28  ;;  %90 = vmatprep.subr.mxu0 %v56_v29  ;;  %v1830_v44 = vld [vmem:[%s4034_s0 + $0x150] sm:$0xff]  ;;  %v1829_v46 = vld [vmem:[%s4034_s0 + $0x148] sm:$0xff]  ;;  %v1828_v48 = vld [vmem:[%s4034_s0 + $0x140] sm:$0xff] }
  0x11   :  { %196 = vmatprep.subr.mxu1 %v1837_v30  ;;  %91 = vmatpush1.msra.mxu0 %v55_v31  ;;  %v46_v49 = vld [vmem:[%s4034_s0 + $0x38] sm:$0xff]  ;;  %v45_v51 = vld [vmem:[%s4034_s0 + $0x30] sm:$0xff]  ;;  %v44_v53 = vld [vmem:[%s4034_s0 + $0x28] sm:$0xff] }
  0x12   :  { %197 = vmatpush1.msra.mxu1 %v1836_v32  ;;  %92 = vmatprep.subr.mxu0 %v54_v33  ;;  %v1827_v50 = vld [vmem:[%s4034_s0 + $0x138] sm:$0xff]  ;;  %v1826_v52 = vld [vmem:[%s4034_s0 + $0x130] sm:$0xff]  ;;  %v1825_v54 = vld [vmem:[%s4034_s0 + $0x128] sm:$0xff] }
  0x13   :  { %198 = vmatprep.subr.mxu1 %v1835_v34  ;;  %93 = vmatpush1.msra.mxu0 %v53_v35  ;;  %v43_v55 = vld [vmem:[%s4034_s0 + $0x20] sm:$0xff]  ;;  %v42_v57 = vld [vmem:[%s4034_s0 + $0x18] sm:$0xff]  ;;  %v41_v59 = vld [vmem:[%s4034_s0 + $0x10] sm:$0xff] }
  0x14   :  { %199 = vmatpush1.msra.mxu1 %v1834_v36  ;;  %94 = vmatprep.subr.mxu0 %v52_v37  ;;  %v1824_v56 = vld [vmem:[%s4034_s0 + $0x120] sm:$0xff]  ;;  %v1823_v58 = vld [vmem:[%s4034_s0 + $0x118] sm:$0xff]  ;;  %v1822_v60 = vld [vmem:[%s4034_s0 + $0x110] sm:$0xff] }
  0x15   :  { %200 = vmatprep.subr.mxu1 %v1833_v38  ;;  %95 = vmatpush1.msra.mxu0 %v51_v39  ;;  %v40_v61 = vld [vmem:[%s4034_s0 + $0x8] sm:$0xff]  ;;  %v39_v63 = vld [vmem:[%s4034_s0] sm:$0xff]  ;;  %v1883_v2 = vld [vmem:[%s4036_s3 + $0x1f8] sm:$0xff] }
  0x16   :  { %201 = vmatpush1.msra.mxu1 %v1832_v40  ;;  %96 = vmatprep.subr.mxu0 %v50_v41  ;;  %v1821_v62 = vld [vmem:[%s4034_s0 + $0x108] sm:$0xff]  ;;  %v1820_v0 = vld [vmem:[%s4034_s0 + $0x100] sm:$0xff]  ;;  %v295_v5 = vld [vmem:[%s4036_s3 + $0xf8] sm:$0xff] }
  0x17   :  { %202 = vmatprep.subr.mxu1 %v1831_v42  ;;  %97 = vmatpush1.msra.mxu0 %v49_v43  ;;  %v36_v1 = vld [vmem:[%s4035_s1] sm:$0xff]  ;;  %v1867_v6 = vld [vmem:[%s4036_s3 + $0x178] sm:$0xff]  ;;  %v1882_v9 = vld [vmem:[%s4036_s3 + $0x1f0] sm:$0xff] }
  0x18   :  { %203 = vmatpush1.msra.mxu1 %v1830_v44  ;;  %98 = vmatprep.subr.mxu0 %v48_v45  ;;  %v37_v4 = vld [vmem:[%s4037_s2] sm:$0xff]  ;;  %v279_v7 = vld [vmem:[%s4036_s3 + $0x78] sm:$0xff]  ;;  %v294_v10 = vld [vmem:[%s4036_s3 + $0xf0] sm:$0xff] }
  0x19   :  { %204 = vmatprep.subr.mxu1 %v1829_v46  ;;  %99 = vmatpush1.msra.mxu0 %v47_v47  ;;  %v1866_v11 = vld [vmem:[%s4036_s3 + $0x170] sm:$0xff]  ;;  %v1881_v13 = vld [vmem:[%s4036_s3 + $0x1e8] sm:$0xff]  ;;  %v1880_v17 = vld [vmem:[%s4036_s3 + $0x1e0] sm:$0xff] }
  0x1a   :  { %205 = vmatpush1.msra.mxu1 %v1828_v48  ;;  %100 = vmatprep.subr.mxu0 %v46_v49  ;;  %v278_v12 = vld [vmem:[%s4036_s3 + $0x70] sm:$0xff]  ;;  %v293_v14 = vld [vmem:[%s4036_s3 + $0xe8] sm:$0xff]  ;;  %v292_v18 = vld [vmem:[%s4036_s3 + $0xe0] sm:$0xff] }
  0x1b   :  { %206 = vmatprep.subr.mxu1 %v1827_v50  ;;  %101 = vmatpush1.msra.mxu0 %v45_v51  ;;  %v1865_v15 = vld [vmem:[%s4036_s3 + $0x168] sm:$0xff]  ;;  %v1864_v19 = vld [vmem:[%s4036_s3 + $0x160] sm:$0xff]  ;;  %v1879_v21 = vld [vmem:[%s4036_s3 + $0x1d8] sm:$0xff] }
  0x1c   :  { %207 = vmatpush1.msra.mxu1 %v1826_v52  ;;  %102 = vmatprep.subr.mxu0 %v44_v53  ;;  %v277_v16 = vld [vmem:[%s4036_s3 + $0x68] sm:$0xff]  ;;  %v276_v20 = vld [vmem:[%s4036_s3 + $0x60] sm:$0xff]  ;;  %v291_v22 = vld [vmem:[%s4036_s3 + $0xd8] sm:$0xff] }
  0x1d   :  { %208 = vmatprep.subr.mxu1 %v1825_v54  ;;  %103 = vmatpush1.msra.mxu0 %v43_v55  ;;  %v1863_v23 = vld [vmem:[%s4036_s3 + $0x158] sm:$0xff]  ;;  %v1878_v25 = vld [vmem:[%s4036_s3 + $0x1d0] sm:$0xff]  ;;  %v1877_v29 = vld [vmem:[%s4036_s3 + $0x1c8] sm:$0xff] }
  0x1e   :  { %209 = vmatpush1.msra.mxu1 %v1824_v56  ;;  %104 = vmatprep.subr.mxu0 %v42_v57  ;;  %v275_v24 = vld [vmem:[%s4036_s3 + $0x58] sm:$0xff]  ;;  %v290_v26 = vld [vmem:[%s4036_s3 + $0xd0] sm:$0xff]  ;;  %v289_v30 = vld [vmem:[%s4036_s3 + $0xc8] sm:$0xff] }
  0x1f   :  { %210 = vmatprep.subr.mxu1 %v1823_v58  ;;  %105 = vmatpush1.msra.mxu0 %v41_v59  ;;  %v1862_v27 = vld [vmem:[%s4036_s3 + $0x150] sm:$0xff]  ;;  %v1861_v31 = vld [vmem:[%s4036_s3 + $0x148] sm:$0xff]  ;;  %v1876_v33 = vld [vmem:[%s4036_s3 + $0x1c0] sm:$0xff] }
  0x20   :  { %211 = vmatpush1.msra.mxu1 %v1822_v60  ;;  %106 = vmatprep.subr.mxu0 %v40_v61  ;;  %v274_v28 = vld [vmem:[%s4036_s3 + $0x50] sm:$0xff]  ;;  %v273_v32 = vld [vmem:[%s4036_s3 + $0x48] sm:$0xff]  ;;  %v288_v34 = vld [vmem:[%s4036_s3 + $0xc0] sm:$0xff] }
  0x21   :  { %212 = vmatprep.subr.mxu1 %v1821_v62  ;;  %107 = vmatpush1.msra.mxu0 %v39_v63  ;;  %v1860_v35 = vld [vmem:[%s4036_s3 + $0x140] sm:$0xff]  ;;  %v1875_v37 = vld [vmem:[%s4036_s3 + $0x1b8] sm:$0xff]  ;;  %v1874_v41 = vld [vmem:[%s4036_s3 + $0x1b0] sm:$0xff] }
  0x22   :  { %213 = vmatpush1.msra.mxu1 %v1820_v0  ;;  %141 = vmatmul.mubr.f32.vlgmr.msra.gmra.mxu0 %v36_v1  ;;  %v272_v36 = vld [vmem:[%s4036_s3 + $0x40] sm:$0xff]  ;;  %v287_v38 = vld [vmem:[%s4036_s3 + $0xb8] sm:$0xff]  ;;  %v286_v42 = vld [vmem:[%s4036_s3 + $0xb0] sm:$0xff] }
  0x23   :  { %247 = vmatmul.mubr.f32.vlgmr.msra.gmra.mxu1 %v36_v1  ;;  %2422 = vset.pattern.permute.xlu0 %v2456_v8  ;;  %v1859_v39 = vld [vmem:[%s4036_s3 + $0x138] sm:$0xff]  ;;  %v1858_v43 = vld [vmem:[%s4036_s3 + $0x130] sm:$0xff]  ;;  %v1873_v45 = vld [vmem:[%s4036_s3 + $0x1a8] sm:$0xff] }
  0x24   :  { %2086 = vmatprep.subr.mxu0 %v1883_v2  ;;  %73 = vperm.xlu0 %2422, %v37_v4   ;;  %v271_v40 = vld [vmem:[%s4036_s3 + $0x38] sm:$0xff]  ;;  %v270_v44 = vld [vmem:[%s4036_s3 + $0x30] sm:$0xff]  ;;  %v285_v46 = vld [vmem:[%s4036_s3 + $0xa8] sm:$0xff] }
  0x25   :  { %2121 = vmatprep.subr.mxu1 %v295_v5  ;;  %2087 = vmatpush3.msra.mxu0 %v1867_v6  ;;  %v1857_v47 = vld [vmem:[%s4036_s3 + $0x128] sm:$0xff]  ;;  %v1872_v49 = vld [vmem:[%s4036_s3 + $0x1a0] sm:$0xff]  ;;  %v1871_v53 = vld [vmem:[%s4036_s3 + $0x198] sm:$0xff] }
  0x26   :  { %2122 = vmatpush3.msra.mxu1 %v279_v7  ;;  %2088 = vmatprep.subr.mxu0 %v1882_v9  ;;  %v269_v48 = vld [vmem:[%s4036_s3 + $0x28] sm:$0xff]  ;;  %v284_v50 = vld [vmem:[%s4036_s3 + $0xa0] sm:$0xff]  ;;  %v283_v54 = vld [vmem:[%s4036_s3 + $0x98] sm:$0xff] }
  0x27   :  { %2123 = vmatprep.subr.mxu1 %v294_v10  ;;  %2089 = vmatpush3.msra.mxu0 %v1866_v11  ;;  %v1856_v51 = vld [vmem:[%s4036_s3 + $0x120] sm:$0xff]  ;;  %v1855_v55 = vld [vmem:[%s4036_s3 + $0x118] sm:$0xff]  ;;  %v1870_v57 = vld [vmem:[%s4036_s3 + $0x190] sm:$0xff] }
  0x28   :  { %2124 = vmatpush3.msra.mxu1 %v278_v12  ;;  %2090 = vmatprep.subr.mxu0 %v1881_v13  ;;  %v268_v52 = vld [vmem:[%s4036_s3 + $0x20] sm:$0xff]  ;;  %v267_v56 = vld [vmem:[%s4036_s3 + $0x18] sm:$0xff]  ;;  %v282_v58 = vld [vmem:[%s4036_s3 + $0x90] sm:$0xff] }
  0x29   :  { %2125 = vmatprep.subr.mxu1 %v293_v14  ;;  %2091 = vmatpush3.msra.mxu0 %v1865_v15  ;;  %v1854_v59 = vld [vmem:[%s4036_s3 + $0x110] sm:$0xff]  ;;  %v1869_v61 = vld [vmem:[%s4036_s3 + $0x188] sm:$0xff]  ;;  %v1868_v1 = vld [vmem:[%s4036_s3 + $0x180] sm:$0xff] }
  0x2a   :  { %2126 = vmatpush3.msra.mxu1 %v277_v16  ;;  %2092 = vmatprep.subr.mxu0 %v1880_v17  ;;  %v266_v60 = vld [vmem:[%s4036_s3 + $0x10] sm:$0xff]  ;;  %v281_v62 = vld [vmem:[%s4036_s3 + $0x88] sm:$0xff]  ;;  %v280_v2 = vld [vmem:[%s4036_s3 + $0x80] sm:$0xff] }
  0x2b   :  { %2127 = vmatprep.subr.mxu1 %v292_v18  ;;  %2093 = vmatpush3.msra.mxu0 %v1864_v19  ;;  %v1853_v63 = vld [vmem:[%s4036_s3 + $0x108] sm:$0xff]  ;;  %v1852_v4 = vld [vmem:[%s4036_s3 + $0x100] sm:$0xff]  ;;  %v1915_v6 = vld [vmem:[%s4036_s3 + $0x2f8] sm:$0xff] }
  0x2c   :  { %2128 = vmatpush3.msra.mxu1 %v276_v20  ;;  %2094 = vmatprep.subr.mxu0 %v1879_v21  ;;  %v265_v0 = vld [vmem:[%s4036_s3 + $0x8] sm:$0xff]  ;;  %v264_v5 = vld [vmem:[%s4036_s3] sm:$0xff]  ;;  %v1947_v7 = vld [vmem:[%s4036_s3 + $0x3f8] sm:$0xff] }
  0x2d   :  { %2129 = vmatprep.subr.mxu1 %v291_v22  ;;  %2095 = vmatpush3.msra.mxu0 %v1863_v23 }
  0x2e   :  { %2130 = vmatpush3.msra.mxu1 %v275_v24  ;;  %2096 = vmatprep.subr.mxu0 %v1878_v25 }
  0x2f   :  { %2131 = vmatprep.subr.mxu1 %v290_v26  ;;  %2097 = vmatpush3.msra.mxu0 %v1862_v27 }
  0x30   :  { %2132 = vmatpush3.msra.mxu1 %v274_v28  ;;  %2098 = vmatprep.subr.mxu0 %v1877_v29  ;;  %v1899_v29 = vld [vmem:[%s4036_s3 + $0x278] sm:$0xff] }
  0x31   :  { %2133 = vmatprep.subr.mxu1 %v289_v30  ;;  %2099 = vmatpush3.msra.mxu0 %v1861_v31  ;;  %v1931_v30 = vld [vmem:[%s4036_s3 + $0x378] sm:$0xff] }
  0x32   :  { %2134 = vmatpush3.msra.mxu1 %v273_v32  ;;  %2100 = vmatprep.subr.mxu0 %v1876_v33 }
  0x33   :  { %2135 = vmatprep.subr.mxu1 %v288_v34  ;;  %2101 = vmatpush3.msra.mxu0 %v1860_v35  ;;  %v1914_v35 = vld [vmem:[%s4036_s3 + $0x2f0] sm:$0xff] }
  0x34   :  { %2136 = vmatpush3.msra.mxu1 %v272_v36  ;;  %2102 = vmatprep.subr.mxu0 %v1875_v37  ;;  %v1946_v36 = vld [vmem:[%s4036_s3 + $0x3f0] sm:$0xff] }
  0x35   :  { %2137 = vmatprep.subr.mxu1 %v287_v38  ;;  %2103 = vmatpush3.msra.mxu0 %v1859_v39 }
  0x36   :  { %2138 = vmatpush3.msra.mxu1 %v271_v40  ;;  %2104 = vmatprep.subr.mxu0 %v1874_v41  ;;  %v1898_v40 = vld [vmem:[%s4036_s3 + $0x270] sm:$0xff] }
  0x37   :  { %2139 = vmatprep.subr.mxu1 %v286_v42  ;;  %2105 = vmatpush3.msra.mxu0 %v1858_v43  ;;  %v1930_v41 = vld [vmem:[%s4036_s3 + $0x370] sm:$0xff] }
  0x38   :  { %2140 = vmatpush3.msra.mxu1 %v270_v44  ;;  %2106 = vmatprep.subr.mxu0 %v1873_v45 }
  0x39   :  { %2141 = vmatprep.subr.mxu1 %v285_v46  ;;  %2107 = vmatpush3.msra.mxu0 %v1857_v47  ;;  %v1913_v46 = vld [vmem:[%s4036_s3 + $0x2e8] sm:$0xff] }
  0x3a   :  { %2142 = vmatpush3.msra.mxu1 %v269_v48  ;;  %2108 = vmatprep.subr.mxu0 %v1872_v49  ;;  %v1945_v47 = vld [vmem:[%s4036_s3 + $0x3e8] sm:$0xff] }
  0x3b   :  { %2143 = vmatprep.subr.mxu1 %v284_v50  ;;  %2109 = vmatpush3.msra.mxu0 %v1856_v51  ;;  %v1897_v51 = vld [vmem:[%s4036_s3 + $0x268] sm:$0xff] }
  0x3c   :  { %2144 = vmatpush3.msra.mxu1 %v268_v52  ;;  %2110 = vmatprep.subr.mxu0 %v1871_v53  ;;  %v1929_v52 = vld [vmem:[%s4036_s3 + $0x368] sm:$0xff] }
  0x3d   :  { %2145 = vmatprep.subr.mxu1 %v283_v54  ;;  %2111 = vmatpush3.msra.mxu0 %v1855_v55 }
  0x3e   :  { %2146 = vmatpush3.msra.mxu1 %v267_v56  ;;  %2112 = vmatprep.subr.mxu0 %v1870_v57  ;;  %v1912_v57 = vld [vmem:[%s4036_s3 + $0x2e0] sm:$0xff] }
  0x3f   :  { %2147 = vmatprep.subr.mxu1 %v282_v58  ;;  %2113 = vmatpush3.msra.mxu0 %v1854_v59  ;;  %v1944_v58 = vld [vmem:[%s4036_s3 + $0x3e0] sm:$0xff] }
  0x40   :  { %2148 = vmatpush3.msra.mxu1 %v266_v60  ;;  %2114 = vmatprep.subr.mxu0 %v1869_v61 }
  0x41   :  { %2149 = vmatprep.subr.mxu1 %v281_v62  ;;  %2115 = vmatpush3.msra.mxu0 %v1853_v63  ;;  %v1896_v62 = vld [vmem:[%s4036_s3 + $0x260] sm:$0xff] }
  0x42   :  { %2150 = vmatpush3.msra.mxu1 %v265_v0  ;;  %2116 = vmatprep.subr.mxu0 %v1868_v1  ;;  %v1928_v63 = vld [vmem:[%s4036_s3 + $0x360] sm:$0xff] }
  0x43   :  { %2151 = vmatprep.subr.mxu1 %v280_v2  ;;  %2117 = vmatpush3.msra.mxu0 %v1852_v4  ;;  %v1911_v2 = vld [vmem:[%s4036_s3 + $0x2d8] sm:$0xff] }
  0x44   :  { %2152 = vmatpush3.msra.mxu1 %v264_v5  ;;  %2156 = vmatprep.subr.mxu0 %v1915_v6  ;;  %v1943_v4 = vld [vmem:[%s4036_s3 + $0x3d8] sm:$0xff] }
  0x45   :  { %2191 = vmatprep.subr.mxu1 %v1947_v7  ;;  %v1895_v6 = vld [vmem:[%s4036_s3 + $0x258] sm:$0xff] }
  0x46   :  { %v1927_v7 = vld [vmem:[%s4036_s3 + $0x358] sm:$0xff] }
  0x9f   :  { %v74_v8 = vpop.permute.xlu0 %73 }
  0xe2   :  { %v142_v9 = vpop.f32.mrf.mxu0 }
  0xe3   :  { %v248_v10 = vpop.f32.mrf.mxu1  ;;  %v143_v11 = vadd.f32 %v142_v9, %v74_v8  ;;  %v1942_v9 = vld [vmem:[%s4036_s3 + $0x3d0] sm:$0xff] }
  0xe4   :  { %v249_v12 = vadd.f32 %v248_v10, %v74_v8  ;;  %v144_v13 = vpop.f32.mrf.mxu0  ;;  %v1894_v10 = vld [vmem:[%s4036_s3 + $0x250] sm:$0xff] }
  0xe5   :  { %v250_v14 = vpop.f32.mrf.mxu1  ;;  %v2912_v15 = vmax.f32 %v143_v11, 0.0  ;;  %v145_v17 = vadd.f32 %v144_v13, %v74_v8  ;;  %v1926_v11 = vld [vmem:[%s4036_s3 + $0x350] sm:$0xff]  ;;  %v1941_v13 = vld [vmem:[%s4036_s3 + $0x3c8] sm:$0xff] }
  0xe6   :  { %v2914_v16 = vmax.f32 %v249_v12, 0.0  ;;  %v251_v18 = vadd.f32 %v250_v14, %v74_v8  ;;  %v1910_v8 = vld [vmem:[%s4036_s3 + $0x2d0] sm:$0xff]  ;;  %v1909_v12 = vld [vmem:[%s4036_s3 + $0x2c8] sm:$0xff] }
  0xe7   :  { %v2916_v19 = vmax.f32 %v145_v17, 0.0  ;;  %v298_v21 = vrot.slane %v2912_v15, 1  ;;  %v705_v37 = vrot.slane %v2912_v15, 4  ;;  %v819_v42 = vrot.slane %v2912_v15, 5  ;;  %v1893_v14 = vld [vmem:[%s4036_s3 + $0x248] sm:$0xff] }
  0xe8   :  { %v2918_v20 = vmax.f32 %v251_v18, 0.0  ;;  %v257_v22 = vrot.slane %v2914_v16, 7  ;;  %v709_v38 = vrot.slane %v2914_v16, 3  ;;  %v823_v43 = vrot.slane %v2914_v16, 4  ;;  %v1925_v17 = vld [vmem:[%s4036_s3 + $0x348] sm:$0xff]  ;;  %v1908_v18 = vld [vmem:[%s4036_s3 + $0x2c0] sm:$0xff] }
  0xe9   :  { %v299_v23 = vrot.slane %v2916_v19, 1  ;;  %v478_v25 = vrot.slane %v2916_v19, 2  ;;  %v592_v31 = vrot.slane %v2916_v19, 3  ;;  %v302_v33 = vsel %vm261_vm0, %v298_v21, %v2914_v16  ;;  %v1940_v21 = vld [vmem:[%s4036_s3 + $0x3c0] sm:$0xff] }
  0xea   :  { %v258_v24 = vrot.slane %v2918_v20, 7  ;;  %v482_v26 = vrot.slane %v2918_v20, 1  ;;  %v596_v32 = vrot.slane %v2918_v20, 2  ;;  %v262_v34 = vsel %vm261_vm0, %v2912_v15, %v257_v22  ;;  %v1892_v22 = vld [vmem:[%s4036_s3 + $0x240] sm:$0xff] }
  0xeb   :  { %v303_v27 = vsel %vm261_vm0, %v299_v23, %v2918_v20  ;;  %v934_v44 = vrot.slane %v2916_v19, 6  ;;  %v2968_v48 = vsel %vm261_vm0, %v705_v37, %v709_v38  ;;  %v938_v49 = vrot.slane %v2918_v20, 5  ;;  %v1924_v23 = vld [vmem:[%s4036_s3 + $0x340] sm:$0xff] }
  0xec   :  { %v263_v28 = vsel %vm261_vm0, %v2916_v19, %v258_v24  ;;  %401 = vmatprep.mubr.f32.mxu0 %v303_v27  ;;  %v486_v39 = vsel %vm261_vm0, %v478_v25, %v482_v26  ;;  %v600_v45 = vsel %vm261_vm0, %v592_v31, %v596_v32  ;;  %v1048_v50 = vrot.slane %v2916_v19, 7  ;;  %v1907_v24 = vld [vmem:[%s4036_s3 + $0x2b8] sm:$0xff]  ;;  %v1922_v31 = vld [vmem:[%s4036_s3 + $0x330] sm:$0xff]  ;;  %v1905_v32 = vld [vmem:[%s4036_s3 + $0x2a8] sm:$0xff] }
  0xed   :  { %471 = vmatprep.mubr.f32.mxu1 %v263_v28  ;;  %402 = vmatmul.mubr.f32.vlgmr.msra.gmra.mxu0 %v302_v33  ;;  %v2979_v53 = vsel %vm261_vm0, %v819_v42, %v823_v43  ;;  %v1052_v54 = vrot.slane %v2918_v20, 6  ;;  %v933_v55 = vrot.slane %v2912_v15, 6  ;;  %v937_v56 = vrot.slane %v2914_v16, 5  ;;  %v1939_v25 = vld [vmem:[%s4036_s3 + $0x3b8] sm:$0xff]  ;;  %v1906_v28 = vld [vmem:[%s4036_s3 + $0x2b0] sm:$0xff]  ;;  %v1937_v33 = vld [vmem:[%s4036_s3 + $0x3a8] sm:$0xff] }
  0xee   :  { %472 = vmatmul.mubr.f32.vlgmr.msra.gmra.mxu1 %v262_v34  ;;  %2157 = vmatpush3.msra.mxu0 %v1899_v29  ;;  %v2991_v59 = vsel %vm261_vm0, %v934_v44, %v938_v49  ;;  %v1047_v60 = vrot.slane %v2912_v15, 7  ;;  %v1051_v61 = vrot.slane %v2914_v16, 6  ;;  %v1891_v26 = vld [vmem:[%s4036_s3 + $0x238] sm:$0xff]  ;;  %v1938_v29 = vld [vmem:[%s4036_s3 + $0x3b0] sm:$0xff]  ;;  %v1889_v34 = vld [vmem:[%s4036_s3 + $0x228] sm:$0xff] }
  0xef   :  { %2192 = vmatpush3.msra.mxu1 %v1931_v30  ;;  %2158 = vmatprep.subr.mxu0 %v1914_v35  ;;  %v3002_v0 = vsel %vm261_vm0, %v1048_v50, %v1052_v54  ;;  %v3005_v1 = vsel %vm261_vm0, %v933_v55, %v937_v56  ;;  %v1923_v27 = vld [vmem:[%s4036_s3 + $0x338] sm:$0xff]  ;;  %v1890_v30 = vld [vmem:[%s4036_s3 + $0x230] sm:$0xff]  ;;  %v1921_v35 = vld [vmem:[%s4036_s3 + $0x328] sm:$0xff]  ;;  %v477_v56 = vrot.slane %v2912_v15, 2 }
  0xf0   :  { %584 = vmatprep.mubr.f32.mxu0 %v486_v39  ;;  %2193 = vmatprep.subr.mxu1 %v1946_v36  ;;  %v3014_v5 = vsel %vm261_vm0, %v1047_v60, %v1051_v61  ;;  %v1904_v36 = vld [vmem:[%s4036_s3 + $0x2a0] sm:$0xff]  ;;  %v1887_v42 = vld [vmem:[%s4036_s3 + $0x218] sm:$0xff]  ;;  %v1902_v44 = vld [vmem:[%s4036_s3 + $0x290] sm:$0xff]  ;;  %v595_v60 = vrot.slane %v2914_v16, 2 }
  0xf1   :  { %698 = vmatprep.mubr.f32.mxu1 %v600_v45  ;;  %2159 = vmatpush3.msra.mxu0 %v1898_v40  ;;  %v1936_v37 = vld [vmem:[%s4036_s3 + $0x3a0] sm:$0xff]  ;;  %v1903_v40 = vld [vmem:[%s4036_s3 + $0x298] sm:$0xff]  ;;  %v1934_v45 = vld [vmem:[%s4036_s3 + $0x390] sm:$0xff] }
  0xf2   :  { %2194 = vmatpush3.msra.mxu1 %v1930_v41  ;;  %2160 = vmatprep.subr.mxu0 %v1913_v46  ;;  %v1888_v38 = vld [vmem:[%s4036_s3 + $0x220] sm:$0xff]  ;;  %v1935_v41 = vld [vmem:[%s4036_s3 + $0x398] sm:$0xff]  ;;  %v1886_v46 = vld [vmem:[%s4036_s3 + $0x210] sm:$0xff] }
  0xf3   :  { %2195 = vmatprep.subr.mxu1 %v1945_v47  ;;  %2161 = vmatpush3.msra.mxu0 %v1897_v51  ;;  %v1920_v39 = vld [vmem:[%s4036_s3 + $0x320] sm:$0xff]  ;;  %v1919_v43 = vld [vmem:[%s4036_s3 + $0x318] sm:$0xff]  ;;  %v1918_v47 = vld [vmem:[%s4036_s3 + $0x310] sm:$0xff] }
  0xf4   :  { %2196 = vmatpush3.msra.mxu1 %v1929_v52  ;;  %2162 = vmatprep.subr.mxu0 %v1912_v57  ;;  %v1901_v49 = vld [vmem:[%s4036_s3 + $0x288] sm:$0xff]  ;;  %v1900_v54 = vld [vmem:[%s4036_s3 + $0x280] sm:$0xff]  ;;  %v481_v57 = vrot.slane %v2914_v16, 1  ;;  %v2011_v16 = vld [vmem:[%s4036_s3 + $0x5f8] sm:$0xff] }
  0xf5   :  { %2197 = vmatprep.subr.mxu1 %v1944_v58  ;;  %2163 = vmatpush3.msra.mxu0 %v1896_v62  ;;  %v1933_v50 = vld [vmem:[%s4036_s3 + $0x388] sm:$0xff]  ;;  %v1932_v55 = vld [vmem:[%s4036_s3 + $0x380] sm:$0xff]  ;;  %v591_v58 = vrot.slane %v2912_v15, 3  ;;  %v1979_v15 = vld [vmem:[%s4036_s3 + $0x4f8] sm:$0xff] }
  0xf6   :  { %2198 = vmatpush3.msra.mxu1 %v1928_v63  ;;  %2164 = vmatprep.subr.mxu0 %v1911_v2  ;;  %v1885_v51 = vld [vmem:[%s4036_s3 + $0x208] sm:$0xff]  ;;  %v1884_v61 = vld [vmem:[%s4036_s3 + $0x200] sm:$0xff]  ;;  %v706_v63 = vrot.slane %v2916_v19, 4  ;;  %v710_v2 = vrot.slane %v2918_v20, 3 }
  0xf7   :  { %2199 = vmatprep.subr.mxu1 %v1943_v4  ;;  %2165 = vmatpush3.msra.mxu0 %v1895_v6  ;;  %v1917_v52 = vld [vmem:[%s4036_s3 + $0x308] sm:$0xff]  ;;  %v1916_v62 = vld [vmem:[%s4036_s3 + $0x300] sm:$0xff]  ;;  %v820_v4 = vrot.slane %v2916_v19, 5  ;;  %v824_v6 = vrot.slane %v2918_v20, 4  ;;  %v1978_v20 = vld [vmem:[%s4036_s3 + $0x4f0] sm:$0xff] }
  0xf8   :  { %2200 = vmatpush3.msra.mxu1 %v1927_v7  ;;  %2166 = vmatprep.subr.mxu0 %v1910_v8  ;;  %v485_v7 = vsel %vm261_vm0, %v477_v56, %v481_v57  ;;  %v599_v8 = vsel %vm261_vm0, %v591_v58, %v595_v60  ;;  %v714_v19 = vsel %vm261_vm0, %v706_v63, %v710_v2  ;;  %v1985_v56 = vld [vmem:[%s4036_s3 + $0x528] sm:$0xff]  ;;  %v1968_v57 = vld [vmem:[%s4036_s3 + $0x4a0] sm:$0xff]  ;;  %v1999_v63 = vld [vmem:[%s4036_s3 + $0x598] sm:$0xff] }
  0xf9   :  { %2201 = vmatprep.subr.mxu1 %v1942_v9  ;;  %2167 = vmatpush3.msra.mxu0 %v1894_v10  ;;  %v1963_v9 = vld [vmem:[%s4036_s3 + $0x478] sm:$0xff]  ;;  %v2000_v58 = vld [vmem:[%s4036_s3 + $0x5a0] sm:$0xff] }
  0xfa   :  { %2202 = vmatpush3.msra.mxu1 %v1926_v11  ;;  %2168 = vmatprep.subr.mxu0 %v1909_v12  ;;  %v1995_v10 = vld [vmem:[%s4036_s3 + $0x578] sm:$0xff]  ;;  %v2010_v11 = vld [vmem:[%s4036_s3 + $0x5f0] sm:$0xff]  ;;  %v828_v12 = vsel %vm261_vm0, %v820_v4, %v824_v6  ;;  %v1952_v60 = vld [vmem:[%s4036_s3 + $0x420] sm:$0xff] }
  0xfb   :  { %2203 = vmatprep.subr.mxu1 %v1941_v13  ;;  %2169 = vmatpush3.msra.mxu0 %v1893_v14  ;;  %v1962_v13 = vld [vmem:[%s4036_s3 + $0x470] sm:$0xff]  ;;  %v1951_v2 = vld [vmem:[%s4036_s3 + $0x418] sm:$0xff] }
  0xfc   :  { %2204 = vmatpush3.msra.mxu1 %v1925_v17  ;;  %2170 = vmatprep.subr.mxu0 %v1908_v18  ;;  %v1994_v14 = vld [vmem:[%s4036_s3 + $0x570] sm:$0xff]  ;;  %v1977_v17 = vld [vmem:[%s4036_s3 + $0x4e8] sm:$0xff] }
  0xfd   :  { %2205 = vmatprep.subr.mxu1 %v1940_v21  ;;  %2171 = vmatpush3.msra.mxu0 %v1892_v22  ;;  %v2009_v18 = vld [vmem:[%s4036_s3 + $0x5e8] sm:$0xff]  ;;  %v1998_v4 = vld [vmem:[%s4036_s3 + $0x590] sm:$0xff] }
  0xfe   :  { %2206 = vmatpush3.msra.mxu1 %v1924_v23  ;;  %2172 = vmatprep.subr.mxu0 %v1907_v24  ;;  %v1961_v21 = vld [vmem:[%s4036_s3 + $0x468] sm:$0xff]  ;;  %v1976_v23 = vld [vmem:[%s4036_s3 + $0x4e0] sm:$0xff]  ;;  %v1950_v6 = vld [vmem:[%s4036_s3 + $0x410] sm:$0xff] }
  0xff   :  { %2207 = vmatprep.subr.mxu1 %v1939_v25  ;;  %2173 = vmatpush3.msra.mxu0 %v1891_v26  ;;  %v1993_v22 = vld [vmem:[%s4036_s3 + $0x568] sm:$0xff]  ;;  %v2008_v24 = vld [vmem:[%s4036_s3 + $0x5e0] sm:$0xff] }
 0x100   :  { %2208 = vmatpush3.msra.mxu1 %v1923_v27  ;;  %2174 = vmatprep.subr.mxu0 %v1906_v28  ;;  %v1960_v25 = vld [vmem:[%s4036_s3 + $0x460] sm:$0xff]  ;;  %v1975_v27 = vld [vmem:[%s4036_s3 + $0x4d8] sm:$0xff] }
 0x101   :  { %2209 = vmatprep.subr.mxu1 %v1938_v29  ;;  %2175 = vmatpush3.msra.mxu0 %v1890_v30  ;;  %v1992_v26 = vld [vmem:[%s4036_s3 + $0x560] sm:$0xff]  ;;  %v2007_v28 = vld [vmem:[%s4036_s3 + $0x5d8] sm:$0xff] }
 0x102   :  { %2210 = vmatpush3.msra.mxu1 %v1922_v31  ;;  %2176 = vmatprep.subr.mxu0 %v1905_v32  ;;  %v1959_v29 = vld [vmem:[%s4036_s3 + $0x458] sm:$0xff]  ;;  %v1974_v31 = vld [vmem:[%s4036_s3 + $0x4d0] sm:$0xff] }
 0x103   :  { %2211 = vmatprep.subr.mxu1 %v1937_v33  ;;  %2177 = vmatpush3.msra.mxu0 %v1889_v34  ;;  %v1991_v30 = vld [vmem:[%s4036_s3 + $0x558] sm:$0xff]  ;;  %v2006_v32 = vld [vmem:[%s4036_s3 + $0x5d0] sm:$0xff] }
 0x104   :  { %2212 = vmatpush3.msra.mxu1 %v1921_v35  ;;  %2178 = vmatprep.subr.mxu0 %v1904_v36  ;;  %v1958_v33 = vld [vmem:[%s4036_s3 + $0x450] sm:$0xff]  ;;  %v1973_v35 = vld [vmem:[%s4036_s3 + $0x4c8] sm:$0xff] }
 0x105   :  { %2213 = vmatprep.subr.mxu1 %v1936_v37  ;;  %2179 = vmatpush3.msra.mxu0 %v1888_v38  ;;  %v1990_v34 = vld [vmem:[%s4036_s3 + $0x550] sm:$0xff]  ;;  %v2005_v36 = vld [vmem:[%s4036_s3 + $0x5c8] sm:$0xff] }
 0x106   :  { %2214 = vmatpush3.msra.mxu1 %v1920_v39  ;;  %2180 = vmatprep.subr.mxu0 %v1903_v40  ;;  %v1957_v37 = vld [vmem:[%s4036_s3 + $0x448] sm:$0xff]  ;;  %v1972_v39 = vld [vmem:[%s4036_s3 + $0x4c0] sm:$0xff] }
 0x107   :  { %2215 = vmatprep.subr.mxu1 %v1935_v41  ;;  %2181 = vmatpush3.msra.mxu0 %v1887_v42  ;;  %v1989_v38 = vld [vmem:[%s4036_s3 + $0x548] sm:$0xff]  ;;  %v2004_v40 = vld [vmem:[%s4036_s3 + $0x5c0] sm:$0xff] }
 0x108   :  { %2216 = vmatpush3.msra.mxu1 %v1919_v43  ;;  %2182 = vmatprep.subr.mxu0 %v1902_v44  ;;  %v1956_v41 = vld [vmem:[%s4036_s3 + $0x440] sm:$0xff]  ;;  %v1971_v43 = vld [vmem:[%s4036_s3 + $0x4b8] sm:$0xff] }
 0x109   :  { %2217 = vmatprep.subr.mxu1 %v1934_v45  ;;  %2183 = vmatpush3.msra.mxu0 %v1886_v46  ;;  %v1988_v42 = vld [vmem:[%s4036_s3 + $0x540] sm:$0xff]  ;;  %v2003_v44 = vld [vmem:[%s4036_s3 + $0x5b8] sm:$0xff] }
 0x10a   :  { %2218 = vmatpush3.msra.mxu1 %v1918_v47  ;;  %2184 = vmatprep.subr.mxu0 %v1901_v49  ;;  %v1955_v45 = vld [vmem:[%s4036_s3 + $0x438] sm:$0xff]  ;;  %v1970_v47 = vld [vmem:[%s4036_s3 + $0x4b0] sm:$0xff] }
 0x10b   :  { %2219 = vmatprep.subr.mxu1 %v1933_v50  ;;  %2185 = vmatpush3.msra.mxu0 %v1885_v51  ;;  %v1987_v46 = vld [vmem:[%s4036_s3 + $0x538] sm:$0xff]  ;;  %v2002_v49 = vld [vmem:[%s4036_s3 + $0x5b0] sm:$0xff] }
 0x10c   :  { %2220 = vmatpush3.msra.mxu1 %v1917_v52  ;;  %2186 = vmatprep.subr.mxu0 %v1900_v54  ;;  %v1954_v50 = vld [vmem:[%s4036_s3 + $0x430] sm:$0xff]  ;;  %v1969_v52 = vld [vmem:[%s4036_s3 + $0x4a8] sm:$0xff] }
 0x10d   :  { %2221 = vmatprep.subr.mxu1 %v1932_v55  ;;  %2187 = vmatpush3.msra.mxu0 %v1884_v61  ;;  %v1986_v51 = vld [vmem:[%s4036_s3 + $0x530] sm:$0xff]  ;;  %v2001_v54 = vld [vmem:[%s4036_s3 + $0x5a8] sm:$0xff]  ;;  %v1984_v61 = vld [vmem:[%s4036_s3 + $0x520] sm:$0xff] }
 0x10e   :  { %2222 = vmatpush3.msra.mxu1 %v1916_v62  ;;  %585 = vmatmul.mubr.f32.vlgmr.msra.gmra.mxu0 %v485_v7  ;;  %v1953_v55 = vld [vmem:[%s4036_s3 + $0x428] sm:$0xff]  ;;  %v1967_v62 = vld [vmem:[%s4036_s3 + $0x498] sm:$0xff]  ;;  %v1982_v7 = vld [vmem:[%s4036_s3 + $0x510] sm:$0xff] }
 0x10f   :  { %699 = vmatmul.mubr.f32.vlgmr.msra.gmra.mxu1 %v599_v8  ;;  %2226 = vmatprep.subr.mxu0 %v1979_v15  ;;  %v1983_v15 = vld [vmem:[%s4036_s3 + $0x518] sm:$0xff]  ;;  %v1965_v8 = vld [vmem:[%s4036_s3 + $0x488] sm:$0xff] }
 0x110   :  { %2261 = vmatprep.subr.mxu1 %v2011_v16  ;;  %2227 = vmatpush3.msra.mxu0 %v1963_v9  ;;  %v1966_v16 = vld [vmem:[%s4036_s3 + $0x490] sm:$0xff]  ;;  %v1997_v9 = vld [vmem:[%s4036_s3 + $0x588] sm:$0xff] }
 0x111   :  { %812 = vmatprep.mubr.f32.mxu0 %v714_v19  ;;  %2262 = vmatpush3.msra.mxu1 %v1995_v10  ;;  %v1949_v10 = vld [vmem:[%s4036_s3 + $0x408] sm:$0xff] }
 0x112   :  { %926 = vmatprep.mubr.f32.mxu1 %v828_v12  ;;  %2228 = vmatprep.subr.mxu0 %v1978_v20  ;;  %v1981_v19 = vld [vmem:[%s4036_s3 + $0x508] sm:$0xff]  ;;  %v1964_v20 = vld [vmem:[%s4036_s3 + $0x480] sm:$0xff] }
 0x113   :  { %2263 = vmatprep.subr.mxu1 %v2010_v11  ;;  %2229 = vmatpush3.msra.mxu0 %v1962_v13  ;;  %v1996_v11 = vld [vmem:[%s4036_s3 + $0x580] sm:$0xff] }
 0x114   :  { %2264 = vmatpush3.msra.mxu1 %v1994_v14  ;;  %2230 = vmatprep.subr.mxu0 %v1977_v17  ;;  %v1948_v12 = vld [vmem:[%s4036_s3 + $0x400] sm:$0xff]  ;;  %v2043_v14 = vld [vmem:[%s4036_s3 + $0x6f8] sm:$0xff] }
 0x115   :  { %2265 = vmatprep.subr.mxu1 %v2009_v18  ;;  %2231 = vmatpush3.msra.mxu0 %v1961_v21  ;;  %v1980_v13 = vld [vmem:[%s4036_s3 + $0x500] sm:$0xff]  ;;  %v2075_v17 = vld [vmem:[%s4036_s3 + $0x7f8] sm:$0xff] }
 0x116   :  { %2266 = vmatpush3.msra.mxu1 %v1993_v22  ;;  %2232 = vmatprep.subr.mxu0 %v1976_v23  ;;  %v2027_v18 = vld [vmem:[%s4036_s3 + $0x678] sm:$0xff]  ;;  %v2042_v22 = vld [vmem:[%s4036_s3 + $0x6f0] sm:$0xff] }
 0x117   :  { %2267 = vmatprep.subr.mxu1 %v2008_v24  ;;  %2233 = vmatpush3.msra.mxu0 %v1960_v25  ;;  %v2059_v21 = vld [vmem:[%s4036_s3 + $0x778] sm:$0xff]  ;;  %v2074_v23 = vld [vmem:[%s4036_s3 + $0x7f0] sm:$0xff]  ;;  %v2041_v24 = vld [vmem:[%s4036_s3 + $0x6e8] sm:$0xff] }
 0x118   :  { %2268 = vmatpush3.msra.mxu1 %v1992_v26  ;;  %2234 = vmatprep.subr.mxu0 %v1975_v27  ;;  %v2073_v25 = vld [vmem:[%s4036_s3 + $0x7e8] sm:$0xff]  ;;  %v2072_v27 = vld [vmem:[%s4036_s3 + $0x7e0] sm:$0xff] }
 0x119   :  { %2269 = vmatprep.subr.mxu1 %v2007_v28  ;;  %2235 = vmatpush3.msra.mxu0 %v1959_v29  ;;  %v2057_v26 = vld [vmem:[%s4036_s3 + $0x768] sm:$0xff]  ;;  %v2024_v28 = vld [vmem:[%s4036_s3 + $0x660] sm:$0xff] }
 0x11a   :  { %2270 = vmatpush3.msra.mxu1 %v1991_v30  ;;  %2236 = vmatprep.subr.mxu0 %v1974_v31  ;;  %v2056_v29 = vld [vmem:[%s4036_s3 + $0x760] sm:$0xff]  ;;  %v2039_v30 = vld [vmem:[%s4036_s3 + $0x6d8] sm:$0xff] }
 0x11b   :  { %2271 = vmatprep.subr.mxu1 %v2006_v32  ;;  %2237 = vmatpush3.msra.mxu0 %v1958_v33  ;;  %v2071_v31 = vld [vmem:[%s4036_s3 + $0x7d8] sm:$0xff] }
 0x11c   :  { %2272 = vmatpush3.msra.mxu1 %v1990_v34  ;;  %2238 = vmatprep.subr.mxu0 %v1973_v35  ;;  %v2023_v32 = vld [vmem:[%s4036_s3 + $0x658] sm:$0xff]  ;;  %v2038_v34 = vld [vmem:[%s4036_s3 + $0x6d0] sm:$0xff] }
 0x11d   :  { %2273 = vmatprep.subr.mxu1 %v2005_v36  ;;  %2239 = vmatpush3.msra.mxu0 %v1957_v37  ;;  %v2055_v33 = vld [vmem:[%s4036_s3 + $0x758] sm:$0xff]  ;;  %v2070_v35 = vld [vmem:[%s4036_s3 + $0x7d0] sm:$0xff] }
 0x11e   :  { %2274 = vmatpush3.msra.mxu1 %v1989_v38  ;;  %2240 = vmatprep.subr.mxu0 %v1972_v39  ;;  %v2022_v36 = vld [vmem:[%s4036_s3 + $0x650] sm:$0xff]  ;;  %v2037_v38 = vld [vmem:[%s4036_s3 + $0x6c8] sm:$0xff] }
 0x11f   :  { %2275 = vmatprep.subr.mxu1 %v2004_v40  ;;  %2241 = vmatpush3.msra.mxu0 %v1956_v41  ;;  %v2054_v37 = vld [vmem:[%s4036_s3 + $0x750] sm:$0xff]  ;;  %v2069_v39 = vld [vmem:[%s4036_s3 + $0x7c8] sm:$0xff] }
 0x120   :  { %2276 = vmatpush3.msra.mxu1 %v1988_v42  ;;  %2242 = vmatprep.subr.mxu0 %v1971_v43  ;;  %v2021_v40 = vld [vmem:[%s4036_s3 + $0x648] sm:$0xff]  ;;  %v2036_v42 = vld [vmem:[%s4036_s3 + $0x6c0] sm:$0xff] }
 0x121   :  { %2277 = vmatprep.subr.mxu1 %v2003_v44  ;;  %2243 = vmatpush3.msra.mxu0 %v1955_v45  ;;  %v2053_v41 = vld [vmem:[%s4036_s3 + $0x748] sm:$0xff]  ;;  %v2068_v43 = vld [vmem:[%s4036_s3 + $0x7c0] sm:$0xff] }
 0x122   :  { %2278 = vmatpush3.msra.mxu1 %v1987_v46  ;;  %2244 = vmatprep.subr.mxu0 %v1970_v47  ;;  %v2020_v44 = vld [vmem:[%s4036_s3 + $0x640] sm:$0xff]  ;;  %v2035_v46 = vld [vmem:[%s4036_s3 + $0x6b8] sm:$0xff] }
 0x123   :  { %2279 = vmatprep.subr.mxu1 %v2002_v49  ;;  %2245 = vmatpush3.msra.mxu0 %v1954_v50  ;;  %v2052_v45 = vld [vmem:[%s4036_s3 + $0x740] sm:$0xff]  ;;  %v2067_v47 = vld [vmem:[%s4036_s3 + $0x7b8] sm:$0xff] }
 0x124   :  { %2280 = vmatpush3.msra.mxu1 %v1986_v51  ;;  %2246 = vmatprep.subr.mxu0 %v1969_v52  ;;  %v2019_v49 = vld [vmem:[%s4036_s3 + $0x638] sm:$0xff]  ;;  %v2034_v51 = vld [vmem:[%s4036_s3 + $0x6b0] sm:$0xff] }
 0x125   :  { %2281 = vmatprep.subr.mxu1 %v2001_v54  ;;  %2247 = vmatpush3.msra.mxu0 %v1953_v55  ;;  %v2051_v50 = vld [vmem:[%s4036_s3 + $0x738] sm:$0xff]  ;;  %v2066_v52 = vld [vmem:[%s4036_s3 + $0x7b0] sm:$0xff] }
 0x126   :  { %2282 = vmatpush3.msra.mxu1 %v1985_v56  ;;  %2248 = vmatprep.subr.mxu0 %v1968_v57  ;;  %v2018_v54 = vld [vmem:[%s4036_s3 + $0x630] sm:$0xff]  ;;  %v2033_v56 = vld [vmem:[%s4036_s3 + $0x6a8] sm:$0xff] }
 0x127   :  { %2283 = vmatprep.subr.mxu1 %v2000_v58  ;;  %2249 = vmatpush3.msra.mxu0 %v1952_v60  ;;  %v2050_v55 = vld [vmem:[%s4036_s3 + $0x730] sm:$0xff]  ;;  %v2065_v57 = vld [vmem:[%s4036_s3 + $0x7a8] sm:$0xff] }
 0x128   :  { %2284 = vmatpush3.msra.mxu1 %v1984_v61  ;;  %2250 = vmatprep.subr.mxu0 %v1967_v62  ;;  %v2017_v58 = vld [vmem:[%s4036_s3 + $0x628] sm:$0xff]  ;;  %v2032_v61 = vld [vmem:[%s4036_s3 + $0x6a0] sm:$0xff] }
 0x129   :  { %2285 = vmatprep.subr.mxu1 %v1999_v63  ;;  %2251 = vmatpush3.msra.mxu0 %v1951_v2  ;;  %v2049_v60 = vld [vmem:[%s4036_s3 + $0x728] sm:$0xff]  ;;  %v2064_v62 = vld [vmem:[%s4036_s3 + $0x7a0] sm:$0xff] }
 0x12a   :  { %2286 = vmatpush3.msra.mxu1 %v1983_v15  ;;  %2252 = vmatprep.subr.mxu0 %v1966_v16  ;;  %v2016_v63 = vld [vmem:[%s4036_s3 + $0x620] sm:$0xff]  ;;  %v2031_v15 = vld [vmem:[%s4036_s3 + $0x698] sm:$0xff] }
 0x12b   :  { %2287 = vmatprep.subr.mxu1 %v1998_v4  ;;  %2253 = vmatpush3.msra.mxu0 %v1950_v6  ;;  %v2048_v2 = vld [vmem:[%s4036_s3 + $0x720] sm:$0xff]  ;;  %v2063_v16 = vld [vmem:[%s4036_s3 + $0x798] sm:$0xff] }
 0x12c   :  { %2288 = vmatpush3.msra.mxu1 %v1982_v7  ;;  %2254 = vmatprep.subr.mxu0 %v1965_v8  ;;  %v2015_v4 = vld [vmem:[%s4036_s3 + $0x618] sm:$0xff]  ;;  %v2030_v7 = vld [vmem:[%s4036_s3 + $0x690] sm:$0xff] }
 0x12d   :  { %2289 = vmatprep.subr.mxu1 %v1997_v9  ;;  %2255 = vmatpush3.msra.mxu0 %v1949_v10  ;;  %v2047_v6 = vld [vmem:[%s4036_s3 + $0x718] sm:$0xff]  ;;  %v2062_v8 = vld [vmem:[%s4036_s3 + $0x790] sm:$0xff] }
 0x12e   :  { %2290 = vmatpush3.msra.mxu1 %v1981_v19  ;;  %2256 = vmatprep.subr.mxu0 %v1964_v20  ;;  %v2014_v9 = vld [vmem:[%s4036_s3 + $0x610] sm:$0xff]  ;;  %v2029_v19 = vld [vmem:[%s4036_s3 + $0x688] sm:$0xff] }
 0x12f   :  { %2291 = vmatprep.subr.mxu1 %v1996_v11  ;;  %2257 = vmatpush3.msra.mxu0 %v1948_v12  ;;  %v2046_v10 = vld [vmem:[%s4036_s3 + $0x710] sm:$0xff]  ;;  %v2061_v20 = vld [vmem:[%s4036_s3 + $0x788] sm:$0xff] }
 0x130   :  { %2292 = vmatpush3.msra.mxu1 %v1980_v13  ;;  %813 = vmatmul.mubr.f32.vlgmr.msra.gmra.mxu0 %v2968_v48  ;;  %v2026_v48 = vld [vmem:[%s4036_s3 + $0x670] sm:$0xff]  ;;  %v2013_v11 = vld [vmem:[%s4036_s3 + $0x608] sm:$0xff]  ;;  %v2028_v13 = vld [vmem:[%s4036_s3 + $0x680] sm:$0xff] }
 0x131   :  { %927 = vmatmul.mubr.f32.vlgmr.msra.gmra.mxu1 %v2979_v53  ;;  %2296 = vmatprep.subr.mxu0 %v2043_v14  ;;  %v2058_v53 = vld [vmem:[%s4036_s3 + $0x770] sm:$0xff]  ;;  %v2045_v12 = vld [vmem:[%s4036_s3 + $0x708] sm:$0xff]  ;;  %v2060_v14 = vld [vmem:[%s4036_s3 + $0x780] sm:$0xff] }
 0x132   :  { %2331 = vmatprep.subr.mxu1 %v2075_v17  ;;  %2297 = vmatpush3.msra.mxu0 %v2027_v18  ;;  %v2012_v17 = vld [vmem:[%s4036_s3 + $0x600] sm:$0xff] }
 0x133   :  { %1040 = vmatprep.mubr.f32.mxu0 %v2991_v59  ;;  %2332 = vmatpush3.msra.mxu1 %v2059_v21  ;;  %v2025_v59 = vld [vmem:[%s4036_s3 + $0x668] sm:$0xff]  ;;  %v2044_v18 = vld [vmem:[%s4036_s3 + $0x700] sm:$0xff] }
 0x134   :  { %1154 = vmatprep.mubr.f32.mxu1 %v3002_v0  ;;  %2298 = vmatprep.subr.mxu0 %v2042_v22  ;;  %v2040_v0 = vld [vmem:[%s4036_s3 + $0x6e0] sm:$0xff]  ;;  %v1290_v21 = vld [vmem:[%s4038_s5 + $0x3c8] sm:$0xff]  ;;  %v1292_v22 = vld [vmem:[%s4038_s5 + $0x3d8] sm:$0xff] }
 0x135   :  { %2333 = vmatprep.subr.mxu1 %v2074_v23  ;;  %2299 = vmatpush3.msra.mxu0 %v2026_v48  ;;  %v1289_v23 = vld [vmem:[%s4038_s5 + $0x3c0] sm:$0xff]  ;;  %v1284_v48 = vld [vmem:[%s4038_s5 + $0x398] sm:$0xff] }
 0x136   :  { %2334 = vmatpush3.msra.mxu1 %v2058_v53  ;;  %2300 = vmatprep.subr.mxu0 %v2041_v24  ;;  %v1281_v53 = vld [vmem:[%s4038_s5 + $0x380] sm:$0xff]  ;;  %v1283_v24 = vld [vmem:[%s4038_s5 + $0x390] sm:$0xff] }
 0x137   :  { %2335 = vmatprep.subr.mxu1 %v2073_v25  ;;  %2301 = vmatpush3.msra.mxu0 %v2025_v59  ;;  %v1274_v25 = vld [vmem:[%s4038_s5 + $0x348] sm:$0xff]  ;;  %v1276_v59 = vld [vmem:[%s4038_s5 + $0x358] sm:$0xff] }
 0x138   :  { %2336 = vmatpush3.msra.mxu1 %v2057_v26  ;;  %2302 = vmatprep.subr.mxu0 %v2040_v0  ;;  %v1273_v26 = vld [vmem:[%s4038_s5 + $0x340] sm:$0xff]  ;;  %v1275_v0 = vld [vmem:[%s4038_s5 + $0x350] sm:$0xff] }
 0x139   :  { %2337 = vmatprep.subr.mxu1 %v2072_v27  ;;  %2303 = vmatpush3.msra.mxu0 %v2024_v28  ;;  %v1266_v27 = vld [vmem:[%s4038_s5 + $0x308] sm:$0xff]  ;;  %v1268_v28 = vld [vmem:[%s4038_s5 + $0x318] sm:$0xff] }
 0x13a   :  { %2338 = vmatpush3.msra.mxu1 %v2056_v29  ;;  %2304 = vmatprep.subr.mxu0 %v2039_v30  ;;  %v1265_v29 = vld [vmem:[%s4038_s5 + $0x300] sm:$0xff]  ;;  %v1267_v30 = vld [vmem:[%s4038_s5 + $0x310] sm:$0xff] }
 0x13b   :  { %2339 = vmatprep.subr.mxu1 %v2071_v31  ;;  %2305 = vmatpush3.msra.mxu0 %v2023_v32  ;;  %v1258_v31 = vld [vmem:[%s4038_s5 + $0x2c8] sm:$0xff]  ;;  %v1260_v32 = vld [vmem:[%s4038_s5 + $0x2d8] sm:$0xff] }
 0x13c   :  { %2340 = vmatpush3.msra.mxu1 %v2055_v33  ;;  %2306 = vmatprep.subr.mxu0 %v2038_v34  ;;  %v1257_v33 = vld [vmem:[%s4038_s5 + $0x2c0] sm:$0xff]  ;;  %v1259_v34 = vld [vmem:[%s4038_s5 + $0x2d0] sm:$0xff] }
 0x13d   :  { %2341 = vmatprep.subr.mxu1 %v2070_v35  ;;  %2307 = vmatpush3.msra.mxu0 %v2022_v36  ;;  %v1250_v35 = vld [vmem:[%s4038_s5 + $0x288] sm:$0xff]  ;;  %v1252_v36 = vld [vmem:[%s4038_s5 + $0x298] sm:$0xff] }
 0x13e   :  { %2342 = vmatpush3.msra.mxu1 %v2054_v37  ;;  %2308 = vmatprep.subr.mxu0 %v2037_v38  ;;  %v1249_v37 = vld [vmem:[%s4038_s5 + $0x280] sm:$0xff]  ;;  %v1251_v38 = vld [vmem:[%s4038_s5 + $0x290] sm:$0xff] }
 0x13f   :  { %2343 = vmatprep.subr.mxu1 %v2069_v39  ;;  %2309 = vmatpush3.msra.mxu0 %v2021_v40  ;;  %v1242_v39 = vld [vmem:[%s4038_s5 + $0x248] sm:$0xff]  ;;  %v1244_v40 = vld [vmem:[%s4038_s5 + $0x258] sm:$0xff] }
 0x140   :  { %2344 = vmatpush3.msra.mxu1 %v2053_v41  ;;  %2310 = vmatprep.subr.mxu0 %v2036_v42  ;;  %v1241_v41 = vld [vmem:[%s4038_s5 + $0x240] sm:$0xff]  ;;  %v1243_v42 = vld [vmem:[%s4038_s5 + $0x250] sm:$0xff] }
 0x141   :  { %2345 = vmatprep.subr.mxu1 %v2068_v43  ;;  %2311 = vmatpush3.msra.mxu0 %v2020_v44  ;;  %v1234_v43 = vld [vmem:[%s4038_s5 + $0x208] sm:$0xff]  ;;  %v1236_v44 = vld [vmem:[%s4038_s5 + $0x218] sm:$0xff] }
 0x142   :  { %2346 = vmatpush3.msra.mxu1 %v2052_v45  ;;  %2312 = vmatprep.subr.mxu0 %v2035_v46  ;;  %v1233_v45 = vld [vmem:[%s4038_s5 + $0x200] sm:$0xff]  ;;  %v1235_v46 = vld [vmem:[%s4038_s5 + $0x210] sm:$0xff] }
 0x143   :  { %2347 = vmatprep.subr.mxu1 %v2067_v47  ;;  %2313 = vmatpush3.msra.mxu0 %v2019_v49  ;;  %v1226_v47 = vld [vmem:[%s4038_s5 + $0x1c8] sm:$0xff]  ;;  %v1228_v49 = vld [vmem:[%s4038_s5 + $0x1d8] sm:$0xff] }
 0x144   :  { %2348 = vmatpush3.msra.mxu1 %v2051_v50  ;;  %2314 = vmatprep.subr.mxu0 %v2034_v51  ;;  %v1225_v50 = vld [vmem:[%s4038_s5 + $0x1c0] sm:$0xff]  ;;  %v1227_v51 = vld [vmem:[%s4038_s5 + $0x1d0] sm:$0xff] }
 0x145   :  { %2349 = vmatprep.subr.mxu1 %v2066_v52  ;;  %2315 = vmatpush3.msra.mxu0 %v2018_v54  ;;  %v1218_v52 = vld [vmem:[%s4038_s5 + $0x188] sm:$0xff]  ;;  %v1220_v54 = vld [vmem:[%s4038_s5 + $0x198] sm:$0xff] }
 0x146   :  { %2350 = vmatpush3.msra.mxu1 %v2050_v55  ;;  %2316 = vmatprep.subr.mxu0 %v2033_v56  ;;  %v1217_v55 = vld [vmem:[%s4038_s5 + $0x180] sm:$0xff]  ;;  %v1219_v56 = vld [vmem:[%s4038_s5 + $0x190] sm:$0xff] }
 0x147   :  { %2351 = vmatprep.subr.mxu1 %v2065_v57  ;;  %2317 = vmatpush3.msra.mxu0 %v2017_v58  ;;  %v1210_v57 = vld [vmem:[%s4038_s5 + $0x148] sm:$0xff]  ;;  %v1212_v58 = vld [vmem:[%s4038_s5 + $0x158] sm:$0xff] }
 0x148   :  { %2352 = vmatpush3.msra.mxu1 %v2049_v60  ;;  %2318 = vmatprep.subr.mxu0 %v2032_v61  ;;  %v1209_v60 = vld [vmem:[%s4038_s5 + $0x140] sm:$0xff]  ;;  %v1211_v61 = vld [vmem:[%s4038_s5 + $0x150] sm:$0xff] }
 0x149   :  { %2353 = vmatprep.subr.mxu1 %v2064_v62  ;;  %2319 = vmatpush3.msra.mxu0 %v2016_v63  ;;  %v1202_v62 = vld [vmem:[%s4038_s5 + $0x108] sm:$0xff]  ;;  %v1204_v63 = vld [vmem:[%s4038_s5 + $0x118] sm:$0xff] }
 0x14a   :  { %2354 = vmatpush3.msra.mxu1 %v2048_v2  ;;  %2320 = vmatprep.subr.mxu0 %v2031_v15  ;;  %v1201_v2 = vld [vmem:[%s4038_s5 + $0x100] sm:$0xff]  ;;  %v1203_v15 = vld [vmem:[%s4038_s5 + $0x110] sm:$0xff] }
 0x14b   :  { %2355 = vmatprep.subr.mxu1 %v2063_v16  ;;  %2321 = vmatpush3.msra.mxu0 %v2015_v4  ;;  %v1194_v16 = vld [vmem:[%s4038_s5 + $0xc8] sm:$0xff]  ;;  %v1196_v4 = vld [vmem:[%s4038_s5 + $0xd8] sm:$0xff] }
 0x14c   :  { %2356 = vmatpush3.msra.mxu1 %v2047_v6  ;;  %2322 = vmatprep.subr.mxu0 %v2030_v7  ;;  %v1193_v6 = vld [vmem:[%s4038_s5 + $0xc0] sm:$0xff]  ;;  %v1195_v7 = vld [vmem:[%s4038_s5 + $0xd0] sm:$0xff] }
 0x14d   :  { %2357 = vmatprep.subr.mxu1 %v2062_v8  ;;  %2323 = vmatpush3.msra.mxu0 %v2014_v9  ;;  %v1186_v8 = vld [vmem:[%s4038_s5 + $0x88] sm:$0xff]  ;;  %v1188_v9 = vld [vmem:[%s4038_s5 + $0x98] sm:$0xff] }
 0x14e   :  { %2358 = vmatpush3.msra.mxu1 %v2046_v10  ;;  %2324 = vmatprep.subr.mxu0 %v2029_v19  ;;  %v1185_v10 = vld [vmem:[%s4038_s5 + $0x80] sm:$0xff]  ;;  %v1187_v19 = vld [vmem:[%s4038_s5 + $0x90] sm:$0xff] }
 0x14f   :  { %2359 = vmatprep.subr.mxu1 %v2061_v20  ;;  %2325 = vmatpush3.msra.mxu0 %v2013_v11  ;;  %v1178_v20 = vld [vmem:[%s4038_s5 + $0x48] sm:$0xff]  ;;  %v1180_v11 = vld [vmem:[%s4038_s5 + $0x58] sm:$0xff] }
 0x150   :  { %2360 = vmatpush3.msra.mxu1 %v2045_v12  ;;  %2326 = vmatprep.subr.mxu0 %v2028_v13  ;;  %v1177_v12 = vld [vmem:[%s4038_s5 + $0x40] sm:$0xff]  ;;  %v1179_v13 = vld [vmem:[%s4038_s5 + $0x50] sm:$0xff] }
 0x151   :  { %2361 = vmatprep.subr.mxu1 %v2060_v14  ;;  %2327 = vmatpush3.msra.mxu0 %v2012_v17  ;;  %v1170_v14 = vld [vmem:[%s4038_s5 + $0x8] sm:$0xff]  ;;  %v1172_v17 = vld [vmem:[%s4038_s5 + $0x18] sm:$0xff] }
 0x152   :  { %2362 = vmatpush3.msra.mxu1 %v2044_v18  ;;  %1041 = vmatmul.mubr.f32.vlgmr.msra.gmra.mxu0 %v3005_v1  ;;  %v1291_v1 = vld [vmem:[%s4038_s5 + $0x3d0] sm:$0xff]  ;;  %v1169_v18 = vld [vmem:[%s4038_s5] sm:$0xff] }
 0x153   :  { %1155 = vmatmul.mubr.f32.vlgmr.msra.gmra.mxu1 %v3014_v5  ;;  %1403 = vmatprep.mubr.f32.mxu0 %v2455_v3  ;;  %v1282_v5 = vld [vmem:[%s4038_s5 + $0x388] sm:$0xff] }
 0x154   :  { %1474 = vmatprep.mubr.f32.mxu1 %v2455_v3  ;;  %1339 = vmatprep.subr.mxu0 %v1290_v21  ;;  %v1171_v21 = vld [vmem:[%s4038_s5 + $0x10] sm:$0xff] }
 0x155   :  { %1410 = vmatprep.subr.mxu1 %v1292_v22  ;;  %1340 = vmatpush1.msra.mxu0 %v1289_v23  ;;  %v1294_v22 = vld [vmem:[%s4038_s5 + $0x3e8] sm:$0xff]  ;;  %v1296_v23 = vld [vmem:[%s4038_s5 + $0x3f8] sm:$0xff] }
 0x156   :  { %1411 = vmatpush1.msra.mxu1 %v1291_v1  ;;  %1341 = vmatprep.subr.mxu0 %v1282_v5 }
 0x157   :  { %1412 = vmatprep.subr.mxu1 %v1284_v48  ;;  %1342 = vmatpush1.msra.mxu0 %v1281_v53 }
 0x158   :  { %1413 = vmatpush1.msra.mxu1 %v1283_v24  ;;  %1343 = vmatprep.subr.mxu0 %v1274_v25 }
 0x159   :  { %1414 = vmatprep.subr.mxu1 %v1276_v59  ;;  %1344 = vmatpush1.msra.mxu0 %v1273_v26 }
 0x15a   :  { %1415 = vmatpush1.msra.mxu1 %v1275_v0  ;;  %1345 = vmatprep.subr.mxu0 %v1266_v27 }
 0x15b   :  { %1416 = vmatprep.subr.mxu1 %v1268_v28  ;;  %1346 = vmatpush1.msra.mxu0 %v1265_v29 }
 0x15c   :  { %1417 = vmatpush1.msra.mxu1 %v1267_v30  ;;  %1347 = vmatprep.subr.mxu0 %v1258_v31 }
 0x15d   :  { %1418 = vmatprep.subr.mxu1 %v1260_v32  ;;  %1348 = vmatpush1.msra.mxu0 %v1257_v33 }
 0x15e   :  { %1419 = vmatpush1.msra.mxu1 %v1259_v34  ;;  %1349 = vmatprep.subr.mxu0 %v1250_v35 }
 0x15f   :  { %1420 = vmatprep.subr.mxu1 %v1252_v36  ;;  %1350 = vmatpush1.msra.mxu0 %v1249_v37 }
 0x160   :  { %1421 = vmatpush1.msra.mxu1 %v1251_v38  ;;  %1351 = vmatprep.subr.mxu0 %v1242_v39 }
 0x161   :  { %1422 = vmatprep.subr.mxu1 %v1244_v40  ;;  %1352 = vmatpush1.msra.mxu0 %v1241_v41 }
 0x162   :  { %1423 = vmatpush1.msra.mxu1 %v1243_v42  ;;  %1353 = vmatprep.subr.mxu0 %v1234_v43 }
 0x163   :  { %1424 = vmatprep.subr.mxu1 %v1236_v44  ;;  %1354 = vmatpush1.msra.mxu0 %v1233_v45 }
 0x164   :  { %1425 = vmatpush1.msra.mxu1 %v1235_v46  ;;  %1355 = vmatprep.subr.mxu0 %v1226_v47 }
 0x165   :  { %1426 = vmatprep.subr.mxu1 %v1228_v49  ;;  %1356 = vmatpush1.msra.mxu0 %v1225_v50  ;;  %v2076_v49 = vld [vmem:[%s4039_s4] ss:$0 sm:$0xff] }
 0x166   :  { %1427 = vmatpush1.msra.mxu1 %v1227_v51  ;;  %1357 = vmatprep.subr.mxu0 %v1218_v52 }
 0x167   :  { %1428 = vmatprep.subr.mxu1 %v1220_v54  ;;  %1358 = vmatpush1.msra.mxu0 %v1217_v55  ;;  %v1293_v54 = vld [vmem:[%s4038_s5 + $0x3e0] sm:$0xff]  ;;  %v1295_v55 = vld [vmem:[%s4038_s5 + $0x3f0] sm:$0xff] }
 0x168   :  { %1429 = vmatpush1.msra.mxu1 %v1219_v56  ;;  %1359 = vmatprep.subr.mxu0 %v1210_v57  ;;  %v1286_v56 = vld [vmem:[%s4038_s5 + $0x3a8] sm:$0xff]  ;;  %v1288_v57 = vld [vmem:[%s4038_s5 + $0x3b8] sm:$0xff] }
 0x169   :  { %1430 = vmatprep.subr.mxu1 %v1212_v58  ;;  %1360 = vmatpush1.msra.mxu0 %v1209_v60  ;;  %v1285_v58 = vld [vmem:[%s4038_s5 + $0x3a0] sm:$0xff]  ;;  %v1287_v60 = vld [vmem:[%s4038_s5 + $0x3b0] sm:$0xff] }
 0x16a   :  { %1431 = vmatpush1.msra.mxu1 %v1211_v61  ;;  %1361 = vmatprep.subr.mxu0 %v1202_v62  ;;  %v1278_v61 = vld [vmem:[%s4038_s5 + $0x368] sm:$0xff]  ;;  %v1280_v62 = vld [vmem:[%s4038_s5 + $0x378] sm:$0xff] }
 0x16b   :  { %1432 = vmatprep.subr.mxu1 %v1204_v63  ;;  %1362 = vmatpush1.msra.mxu0 %v1201_v2  ;;  %v1277_v63 = vld [vmem:[%s4038_s5 + $0x360] sm:$0xff]  ;;  %v1279_v2 = vld [vmem:[%s4038_s5 + $0x370] sm:$0xff] }
 0x16c   :  { %1433 = vmatpush1.msra.mxu1 %v1203_v15  ;;  %1363 = vmatprep.subr.mxu0 %v1194_v16  ;;  %v1270_v15 = vld [vmem:[%s4038_s5 + $0x328] sm:$0xff]  ;;  %v1272_v16 = vld [vmem:[%s4038_s5 + $0x338] sm:$0xff] }
 0x16d   :  { %1434 = vmatprep.subr.mxu1 %v1196_v4  ;;  %1364 = vmatpush1.msra.mxu0 %v1193_v6  ;;  %v1269_v4 = vld [vmem:[%s4038_s5 + $0x320] sm:$0xff]  ;;  %v1271_v6 = vld [vmem:[%s4038_s5 + $0x330] sm:$0xff] }
 0x16e   :  { %1435 = vmatpush1.msra.mxu1 %v1195_v7  ;;  %1365 = vmatprep.subr.mxu0 %v1186_v8  ;;  %v1262_v7 = vld [vmem:[%s4038_s5 + $0x2e8] sm:$0xff]  ;;  %v1264_v8 = vld [vmem:[%s4038_s5 + $0x2f8] sm:$0xff] }
 0x16f   :  { %1436 = vmatprep.subr.mxu1 %v1188_v9  ;;  %1366 = vmatpush1.msra.mxu0 %v1185_v10  ;;  %v1261_v9 = vld [vmem:[%s4038_s5 + $0x2e0] sm:$0xff]  ;;  %v1263_v10 = vld [vmem:[%s4038_s5 + $0x2f0] sm:$0xff] }
 0x170   :  { %1437 = vmatpush1.msra.mxu1 %v1187_v19  ;;  %1367 = vmatprep.subr.mxu0 %v1178_v20  ;;  %v1254_v19 = vld [vmem:[%s4038_s5 + $0x2a8] sm:$0xff]  ;;  %v1256_v20 = vld [vmem:[%s4038_s5 + $0x2b8] sm:$0xff] }
 0x171   :  { %1438 = vmatprep.subr.mxu1 %v1180_v11  ;;  %1368 = vmatpush1.msra.mxu0 %v1177_v12  ;;  %v1253_v11 = vld [vmem:[%s4038_s5 + $0x2a0] sm:$0xff]  ;;  %v1255_v12 = vld [vmem:[%s4038_s5 + $0x2b0] sm:$0xff] }
 0x172   :  { %1439 = vmatpush1.msra.mxu1 %v1179_v13  ;;  %1369 = vmatprep.subr.mxu0 %v1170_v14  ;;  %v1246_v13 = vld [vmem:[%s4038_s5 + $0x268] sm:$0xff]  ;;  %v1248_v14 = vld [vmem:[%s4038_s5 + $0x278] sm:$0xff] }
 0x173   :  { %1440 = vmatprep.subr.mxu1 %v1172_v17  ;;  %1370 = vmatpush1.msra.mxu0 %v1169_v18  ;;  %v1245_v17 = vld [vmem:[%s4038_s5 + $0x260] sm:$0xff]  ;;  %v1247_v18 = vld [vmem:[%s4038_s5 + $0x270] sm:$0xff] }
 0x174   :  { %1441 = vmatpush1.msra.mxu1 %v1171_v21  ;;  %1481 = vmatprep.subr.mxu0 %v1294_v22  ;;  %v1238_v21 = vld [vmem:[%s4038_s5 + $0x228] sm:$0xff]  ;;  %v1240_v22 = vld [vmem:[%s4038_s5 + $0x238] sm:$0xff] }
 0x175   :  { %1552 = vmatprep.subr.mxu1 %v1296_v23  ;;  %v1237_v23 = vld [vmem:[%s4038_s5 + $0x220] sm:$0xff] }
 0x1ad   :  { %v2118_v1 = vpop.f32.mrf.mxu0 }
 0x1ae   :  { %v2153_v5 = vpop.f32.mrf.mxu1 }
 0x1af   :  { %v2119_v48 = vpop.f32.mrf.mxu0 }
 0x1b0   :  { %v2154_v24 = vpop.f32.mrf.mxu1  ;;  %v2120_v59 = vadd.f32 %v2119_v48, %v2118_v1  ;;  %v1239_v1 = vld [vmem:[%s4038_s5 + $0x230] sm:$0xff]  ;;  %v1232_v48 = vld [vmem:[%s4038_s5 + $0x1f8] sm:$0xff] }
 0x1b1   :  { %v2155_v26 = vadd.f32 %v2154_v24, %v2153_v5  ;;  %v1230_v5 = vld [vmem:[%s4038_s5 + $0x1e8] sm:$0xff]  ;;  %v1231_v24 = vld [vmem:[%s4038_s5 + $0x1f0] sm:$0xff] }
 0x1b3   :  { %v474_v29 = vadd.f32 %v2155_v26, %v2120_v59  ;;  %v1224_v59 = vld [vmem:[%s4038_s5 + $0x1b8] sm:$0xff]  ;;  %v1221_v26 = vld [vmem:[%s4038_s5 + $0x1a0] sm:$0xff] }
 0x1ce   :  { %v2188_v53 = vpop.f32.mrf.mxu0 }
 0x1cf   :  { %v2223_v0 = vpop.f32.mrf.mxu1 }
 0x1d0   :  { %v2189_v25 = vpop.f32.mrf.mxu0 }
 0x1d1   :  { %v2190_v28 = vadd.f32 %v2189_v25, %v2188_v53  ;;  %v2224_v30 = vpop.f32.mrf.mxu1  ;;  %v1229_v53 = vld [vmem:[%s4038_s5 + $0x1e0] sm:$0xff]  ;;  %v1222_v25 = vld [vmem:[%s4038_s5 + $0x1a8] sm:$0xff] }
 0x1d2   :  { %v2225_v34 = vadd.f32 %v2224_v30, %v2223_v0  ;;  %v1223_v0 = vld [vmem:[%s4038_s5 + $0x1b0] sm:$0xff] }
 0x1d3   :  { %v590_v32 = vadd.f32 %v2190_v28, %v474_v29  ;;  %v1216_v28 = vld [vmem:[%s4038_s5 + $0x178] sm:$0xff]  ;;  %v1213_v29 = vld [vmem:[%s4038_s5 + $0x160] sm:$0xff]  ;;  %v1215_v30 = vld [vmem:[%s4038_s5 + $0x170] sm:$0xff] }
 0x1d5   :  { %v704_v36 = vadd.f32 %v2225_v34, %v590_v32  ;;  %v1208_v32 = vld [vmem:[%s4038_s5 + $0x138] sm:$0xff]  ;;  %v1207_v34 = vld [vmem:[%s4038_s5 + $0x130] sm:$0xff] }
 0x1f0   :  { %v2258_v27 = vpop.f32.mrf.mxu0 }
 0x1f1   :  { %v2293_v33 = vpop.f32.mrf.mxu1 }
 0x1f2   :  { %v2259_v31 = vpop.f32.mrf.mxu0 }
 0x1f3   :  { %v2260_v35 = vadd.f32 %v2259_v31, %v2258_v27  ;;  %v2294_v37 = vpop.f32.mrf.mxu1  ;;  %v1214_v27 = vld [vmem:[%s4038_s5 + $0x168] sm:$0xff] }
 0x1f4   :  { %v2295_v41 = vadd.f32 %v2294_v37, %v2293_v33  ;;  %v1206_v31 = vld [vmem:[%s4038_s5 + $0x128] sm:$0xff]  ;;  %v1205_v33 = vld [vmem:[%s4038_s5 + $0x120] sm:$0xff] }
 0x1f5   :  { %v818_v38 = vadd.f32 %v2260_v35, %v704_v36  ;;  %v1198_v35 = vld [vmem:[%s4038_s5 + $0xe8] sm:$0xff]  ;;  %v1200_v36 = vld [vmem:[%s4038_s5 + $0xf8] sm:$0xff]  ;;  %v1197_v37 = vld [vmem:[%s4038_s5 + $0xe0] sm:$0xff] }
 0x1f7   :  { %v932_v44 = vadd.f32 %v2295_v41, %v818_v38  ;;  %v1199_v38 = vld [vmem:[%s4038_s5 + $0xf0] sm:$0xff]  ;;  %v1189_v41 = vld [vmem:[%s4038_s5 + $0xa0] sm:$0xff] }
 0x212   :  { %v2328_v39 = vpop.f32.mrf.mxu0 }
 0x213   :  { %v2363_v40 = vpop.f32.mrf.mxu1 }
 0x214   :  { %v2329_v42 = vpop.f32.mrf.mxu0 }
 0x215   :  { %v2364_v43 = vpop.f32.mrf.mxu1  ;;  %v2330_v45 = vadd.f32 %v2329_v42, %v2328_v39  ;;  %v1190_v39 = vld [vmem:[%s4038_s5 + $0xa8] sm:$0xff]  ;;  %v1191_v42 = vld [vmem:[%s4038_s5 + $0xb0] sm:$0xff] }
 0x216   :  { %v2365_v47 = vadd.f32 %v2364_v43, %v2363_v40  ;;  %v1192_v40 = vld [vmem:[%s4038_s5 + $0xb8] sm:$0xff]  ;;  %v1182_v43 = vld [vmem:[%s4038_s5 + $0x68] sm:$0xff] }
 0x217   :  { %v1046_v46 = vadd.f32 %v2330_v45, %v932_v44  ;;  %v1184_v44 = vld [vmem:[%s4038_s5 + $0x78] sm:$0xff]  ;;  %v1181_v45 = vld [vmem:[%s4038_s5 + $0x60] sm:$0xff] }
 0x219   :  { %v1160_v50 = vadd.f32 %v2365_v47, %v1046_v46  ;;  %v1183_v46 = vld [vmem:[%s4038_s5 + $0x70] sm:$0xff]  ;;  %v1174_v47 = vld [vmem:[%s4038_s5 + $0x28] sm:$0xff] }
 0x21b   :  { %v1167_v51 = vadd.f32 %v2076_v49, %v1160_v50  ;;  %v1176_v49 = vld [vmem:[%s4038_s5 + $0x38] sm:$0xff]  ;;  %v1173_v50 = vld [vmem:[%s4038_s5 + $0x20] sm:$0xff] }
 0x21d   :  { %v3759_v52 = vmax.f32 %v1167_v51, 0.0  ;;  %v1175_v51 = vld [vmem:[%s4038_s5 + $0x30] sm:$0xff] }
 0x21f   :  { %1404 = vmatmul.mubr.f32.vlgmr.msra.gmra.mxu0 %v3759_v52  ;;  %1475 = vmatmul.mubr.f32.vlgmr.msra.gmra.mxu1 %v3759_v52 }
 0x220   :  { %1482 = vmatpush1.msra.mxu0 %v1293_v54  ;;  %1553 = vmatpush1.msra.mxu1 %v1295_v55  ;;  %v1732_v54 = vld [vmem:[%s4040_s7 + $0x78] sm:$0xff]  ;;  %v1731_v55 = vld [vmem:[%s4040_s7 + $0x70] sm:$0xff] }
 0x221   :  { %1483 = vmatprep.subr.mxu0 %v1286_v56  ;;  %1554 = vmatprep.subr.mxu1 %v1288_v57  ;;  %v1730_v56 = vld [vmem:[%s4040_s7 + $0x68] sm:$0xff]  ;;  %v1729_v57 = vld [vmem:[%s4040_s7 + $0x60] sm:$0xff] }
 0x222   :  { %1484 = vmatpush1.msra.mxu0 %v1285_v58  ;;  %1555 = vmatpush1.msra.mxu1 %v1287_v60  ;;  %v1728_v58 = vld [vmem:[%s4040_s7 + $0x58] sm:$0xff]  ;;  %v1727_v60 = vld [vmem:[%s4040_s7 + $0x50] sm:$0xff] }
 0x223   :  { %1485 = vmatprep.subr.mxu0 %v1278_v61  ;;  %1556 = vmatprep.subr.mxu1 %v1280_v62  ;;  %v1726_v61 = vld [vmem:[%s4040_s7 + $0x48] sm:$0xff]  ;;  %v1725_v62 = vld [vmem:[%s4040_s7 + $0x40] sm:$0xff] }
 0x224   :  { %1486 = vmatpush1.msra.mxu0 %v1277_v63  ;;  %1557 = vmatpush1.msra.mxu1 %v1279_v2  ;;  %v1724_v63 = vld [vmem:[%s4040_s7 + $0x38] sm:$0xff]  ;;  %v1723_v2 = vld [vmem:[%s4040_s7 + $0x30] sm:$0xff] }
 0x225   :  { %1487 = vmatprep.subr.mxu0 %v1270_v15  ;;  %1558 = vmatprep.subr.mxu1 %v1272_v16  ;;  %v1722_v15 = vld [vmem:[%s4040_s7 + $0x28] sm:$0xff]  ;;  %v1721_v16 = vld [vmem:[%s4040_s7 + $0x20] sm:$0xff] }
 0x226   :  { %1488 = vmatpush1.msra.mxu0 %v1269_v4  ;;  %1559 = vmatpush1.msra.mxu1 %v1271_v6  ;;  %v1720_v4 = vld [vmem:[%s4040_s7 + $0x18] sm:$0xff]  ;;  %v1719_v6 = vld [vmem:[%s4040_s7 + $0x10] sm:$0xff] }
 0x227   :  { %1489 = vmatprep.subr.mxu0 %v1262_v7  ;;  %1560 = vmatprep.subr.mxu1 %v1264_v8  ;;  %v1718_v7 = vld [vmem:[%s4040_s7 + $0x8] sm:$0xff]  ;;  %v1717_v8 = vld [vmem:[%s4040_s7] sm:$0xff] }
 0x228   :  { %1490 = vmatpush1.msra.mxu0 %v1261_v9  ;;  %1561 = vmatpush1.msra.mxu1 %v1263_v10  ;;  %v16_v9 = vstv %s4041_s8  ;;  %v1299_v10 = vlaneseq }
 0x229   :  { %1491 = vmatprep.subr.mxu0 %v1254_v19  ;;  %1562 = vmatprep.subr.mxu1 %v1256_v20  ;;  %17 = vst [vmem:[#allocation2] sm:$0x1] %v16_v9 }
 0x22a   :  { %1492 = vmatpush1.msra.mxu0 %v1253_v11  ;;  %1563 = vmatpush1.msra.mxu1 %v1255_v12  ;;  %v1300_v19 = vshrl.u32 %v1299_v10, 7  ;;  %v1297_v12 = vld [vmem:[%s4042_s6] sm:$0xff] }
 0x22b   :  { %1493 = vmatprep.subr.mxu0 %v1246_v13  ;;  %1564 = vmatprep.subr.mxu1 %v1248_v14 }
 0x22c   :  { %1494 = vmatpush1.msra.mxu0 %v1245_v17  ;;  %1565 = vmatpush1.msra.mxu1 %v1247_v18  ;;  %v1301_v20 = vsub.s32 0, %v1300_v19  ;;  %v1309_v11 = vsub.s32 2, %v1300_v19  ;;  %v1305_v13 = vsub.s32 1, %v1300_v19  ;;  %v1313_v14 = vsub.s32 3, %v1300_v19 }
 0x22d   :  { %1495 = vmatprep.subr.mxu0 %v1238_v21  ;;  %1566 = vmatprep.subr.mxu1 %v1240_v22 }
 0x22e   :  { %1496 = vmatpush1.msra.mxu0 %v1237_v23  ;;  %1567 = vmatpush1.msra.mxu1 %v1239_v1  ;;  %v1302_v17 = vrot.slane %v1297_v12, %v1301_v20  ;;  %v1306_v18 = vrot.slane %v1297_v12, %v1305_v13  ;;  %v1314_v21 = vrot.slane %v1297_v12, %v1313_v14 }
 0x22f   :  { %1497 = vmatprep.subr.mxu0 %v1230_v5  ;;  %1568 = vmatprep.subr.mxu1 %v1232_v48 }
 0x230   :  { %1498 = vmatpush1.msra.mxu0 %v1229_v53  ;;  %1569 = vmatpush1.msra.mxu1 %v1231_v24 }
 0x231   :  { %1499 = vmatprep.subr.mxu0 %v1222_v25  ;;  %1570 = vmatprep.subr.mxu1 %v1224_v59 }
 0x232   :  { %1500 = vmatpush1.msra.mxu0 %v1221_v26  ;;  %1571 = vmatpush1.msra.mxu1 %v1223_v0 }
 0x233   :  { %1501 = vmatprep.subr.mxu0 %v1214_v27  ;;  %1572 = vmatprep.subr.mxu1 %v1216_v28 }
 0x234   :  { %1502 = vmatpush1.msra.mxu0 %v1213_v29  ;;  %1573 = vmatpush1.msra.mxu1 %v1215_v30 }
 0x235   :  { %1503 = vmatprep.subr.mxu0 %v1206_v31  ;;  %1574 = vmatprep.subr.mxu1 %v1208_v32 }
 0x236   :  { %1504 = vmatpush1.msra.mxu0 %v1205_v33  ;;  %1575 = vmatpush1.msra.mxu1 %v1207_v34 }
 0x237   :  { %1505 = vmatprep.subr.mxu0 %v1198_v35  ;;  %1576 = vmatprep.subr.mxu1 %v1200_v36  ;;  %v1317_v35 = vsub.s32 4, %v1300_v19  ;;  %v1325_v36 = vsub.s32 6, %v1300_v19 }
 0x238   :  { %1506 = vmatpush1.msra.mxu0 %v1197_v37  ;;  %1577 = vmatpush1.msra.mxu1 %v1199_v38  ;;  %v2458_v37 = vmov 1983009808  }
 0x239   :  { %1507 = vmatprep.subr.mxu0 %v1190_v39  ;;  %1578 = vmatprep.subr.mxu1 %v1192_v40  ;;  %v1682_v38 = vunpack.c.l.s4 %v2458_v37  ;;  %v1321_v39 = vsub.s32 5, %v1300_v19  ;;  %v1329_v40 = vsub.s32 7, %v1300_v19 }
 0x23a   :  { %1508 = vmatpush1.msra.mxu0 %v1189_v41  ;;  %1579 = vmatpush1.msra.mxu1 %v1191_v42  ;;  %v1318_v41 = vrot.slane %v1297_v12, %v1317_v35  ;;  %v1326_v42 = vrot.slane %v1297_v12, %v1325_v36 }
 0x23b   :  { %1509 = vmatprep.subr.mxu0 %v1182_v43  ;;  %1580 = vmatprep.subr.mxu1 %v1184_v44  ;;  %v1683_v43 = vunpack.c.0.s8 %v1682_v38  ;;  %v1322_v44 = vrot.slane %v1297_v12, %v1321_v39 }
 0x23c   :  { %1510 = vmatpush1.msra.mxu0 %v1181_v45  ;;  %1581 = vmatpush1.msra.mxu1 %v1183_v46  ;;  %v1330_v45 = vrot.slane %v1297_v12, %v1329_v40 }
 0x23d   :  { %1511 = vmatprep.subr.mxu0 %v1174_v47  ;;  %1582 = vmatprep.subr.mxu1 %v1176_v49 }
 0x23e   :  { %1512 = vmatpush1.msra.mxu0 %v1173_v50  ;;  %1545 = vmatprep.mubr.f32.mxu0 %v2455_v3 }
 0x23f   :  { %1583 = vmatpush1.msra.mxu1 %v1175_v51  ;;  %1616 = vmatprep.mubr.f32.mxu1 %v2455_v3 }
 0x240   :  { %1546 = vmatmul.mubr.f32.vlgmr.msra.gmra.mxu0 %v3759_v52  ;;  %1617 = vmatmul.mubr.f32.vlgmr.msra.gmra.mxu1 %v3759_v52 }
 0x241   :  { %2383 = vmatprep.subr.mxu0 %v2455_v3  ;;  %2415 = vmatprep.mubr.msk.f32.mxu0 %vm2457_vm1, %v2455_v3 }
 0x242   :  { %2384 = vmatpush3.msra.mxu0 %v1732_v54 }
 0x243   :  { %2385 = vmatprep.subr.mxu0 %v2455_v3 }
 0x244   :  { %2386 = vmatpush3.msra.mxu0 %v1731_v55  ;;  %v1686_v55 = vsub.s32 %v1683_v43, %v1300_v19 }
 0x245   :  { %2387 = vmatprep.subr.mxu0 %v2455_v3 }
 0x246   :  { %2388 = vmatpush3.msra.mxu0 %v1730_v56 }
 0x247   :  { %2389 = vmatprep.subr.mxu0 %v2455_v3 }
 0x248   :  { %2390 = vmatpush3.msra.mxu0 %v1729_v57 }
 0x249   :  { %2391 = vmatprep.subr.mxu0 %v2455_v3 }
 0x24a   :  { %2392 = vmatpush3.msra.mxu0 %v1728_v58 }
 0x24b   :  { %2393 = vmatprep.subr.mxu0 %v2455_v3 }
 0x24c   :  { %2394 = vmatpush3.msra.mxu0 %v1727_v60 }
 0x24d   :  { %2395 = vmatprep.subr.mxu0 %v2455_v3 }
 0x24e   :  { %2396 = vmatpush3.msra.mxu0 %v1726_v61 }
 0x24f   :  { %2397 = vmatprep.subr.mxu0 %v2455_v3 }
 0x250   :  { %2398 = vmatpush3.msra.mxu0 %v1725_v62 }
 0x251   :  { %2399 = vmatprep.subr.mxu0 %v2455_v3 }
 0x252   :  { %2400 = vmatpush3.msra.mxu0 %v1724_v63 }
 0x253   :  { %2401 = vmatprep.subr.mxu0 %v2455_v3 }
 0x254   :  { %2402 = vmatpush3.msra.mxu0 %v1723_v2 }
 0x255   :  { %2403 = vmatprep.subr.mxu0 %v2455_v3 }
 0x256   :  { %2404 = vmatpush3.msra.mxu0 %v1722_v15 }
 0x257   :  { %2405 = vmatprep.subr.mxu0 %v2455_v3 }
 0x258   :  { %2406 = vmatpush3.msra.mxu0 %v1721_v16 }
 0x259   :  { %2407 = vmatprep.subr.mxu0 %v2455_v3 }
 0x25a   :  { %2408 = vmatpush3.msra.mxu0 %v1720_v4 }
 0x25b   :  { %2409 = vmatprep.subr.mxu0 %v2455_v3 }
 0x25c   :  { %2410 = vmatpush3.msra.mxu0 %v1719_v6 }
 0x25d   :  { %2411 = vmatprep.subr.mxu0 %v2455_v3 }
 0x25e   :  { %2412 = vmatpush3.msra.mxu0 %v1718_v7 }
 0x25f   :  { %2413 = vmatprep.subr.mxu0 %v2455_v3  ;;  %v1310_v3 = vrot.slane %v1297_v12, %v1309_v11 }
 0x260   :  { %2414 = vmatpush3.msra.mxu0 %v1717_v8 }
 0x261   :  { %2416 = vmatmul.mubr.f32.vlgmr.msra.gmra.mxu0 %v3759_v52 }
 0x2df   :  { %v1405_v52 = vpop.f32.mrf.mxu0  ;;  %v1476_v22 = vpop.f32.mrf.mxu1 }
 0x2e0   :  { %v1406_v23 = vadd.f32 %v1405_v52, %v1302_v17  ;;  %v1477_v1 = vadd.f32 %v1476_v22, %v1310_v3  ;;  %v2085_v3 = vld [vmem:[#allocation2] ss:$0 sm:$0xff] }
 0x2e1   :  { %v1407_v5 = vpop.f32.mrf.mxu0  ;;  %v1478_v48 = vpop.f32.mrf.mxu1 }
 0x2e2   :  { %v2077_v53 = vmul.f32 -1.442695, %v1406_v23  ;;  %v2079_v24 = vmul.f32 -1.442695, %v1477_v1  ;;  %v1408_v25 = vadd.f32 %v1407_v5, %v1306_v18  ;;  %v1479_v59 = vadd.f32 %v1478_v48, %v1314_v21 }
 0x2e4   :  { %2423 = vpow2.f32 %v2077_v53  ;;  %v2078_v26 = vmul.f32 -1.442695, %v1408_v25  ;;  %v2080_v0 = vmul.f32 -1.442695, %v1479_v59 }
 0x2e5   :  { %2425 = vpow2.f32 %v2079_v24 }
 0x2e6   :  { %2427 = vpow2.f32 %v2078_v26 }
 0x2e7   :  { %2429 = vpow2.f32 %v2080_v0 }
 0x2f1   :  { %v2424_v27 = vpop.eup %2423 }
 0x2f2   :  { %v2426_v28 = vpop.eup %2425  ;;  %v1647_v29 = vadd.f32 1.0, %v2424_v27 }
 0x2f3   :  { %v2428_v30 = vpop.eup %2427  ;;  %v1649_v31 = vadd.f32 1.0, %v2426_v28 }
 0x2f4   :  { %v2430_v32 = vpop.eup %2429  ;;  %2431 = vrcp.f32 %v1647_v29  ;;  %v1648_v33 = vadd.f32 1.0, %v2428_v30 }
 0x2f5   :  { %2433 = vrcp.f32 %v1649_v31  ;;  %v1650_v34 = vadd.f32 1.0, %v2430_v32 }
 0x2f6   :  { %2435 = vrcp.f32 %v1648_v33 }
 0x2f7   :  { %2437 = vrcp.f32 %v1650_v34 }
 0x300   :  { %v1547_v46 = vpop.f32.mrf.mxu0  ;;  %v1618_v47 = vpop.f32.mrf.mxu1 }
 0x301   :  { %v2432_v49 = vpop.eup %2431  ;;  %v1548_v50 = vadd.f32 %v1547_v46, %v1318_v41  ;;  %v1619_v51 = vadd.f32 %v1618_v47, %v1326_v42 }
 0x302   :  { %v2434_v54 = vpop.eup %2433  ;;  %v1549_v56 = vpop.f32.mrf.mxu0 }
 0x303   :  { %v1620_v57 = vpop.f32.mrf.mxu1  ;;  %v2436_v58 = vpop.eup %2435  ;;  %v2081_v60 = vmul.f32 -1.442695, %v1548_v50  ;;  %v2083_v61 = vmul.f32 -1.442695, %v1619_v51  ;;  %v1550_v62 = vadd.f32 %v1549_v56, %v1322_v44 }
 0x304   :  { %v1621_v63 = vadd.f32 %v1620_v57, %v1330_v45  ;;  %v2438_v2 = vpop.eup %2437  ;;  %v1679_v15 = vcombine.low %v2432_v49, %v2436_v58 }
 0x305   :  { %v1680_v16 = vcombine.low %v2434_v54, %v2438_v2  ;;  %2439 = vpow2.f32 %v2081_v60  ;;  %v2082_v4 = vmul.f32 -1.442695, %v1550_v62 }
 0x306   :  { %v2084_v6 = vmul.f32 -1.442695, %v1621_v63  ;;  %v1687_v7 = vrot.slane %v1679_v15, %v1686_v55  ;;  %2441 = vpow2.f32 %v2083_v61 }
 0x307   :  { %v1694_v8 = vrot.slane %v1680_v16, %v1686_v55  ;;  %2443 = vpow2.f32 %v2082_v4 }
 0x308   :  { %2445 = vpow2.f32 %v2084_v6 }
 0x309   :  { %v1695_v9 = vcombine.low %v1687_v7, %v1694_v8 }
 0x30b   :  { %1715 = vst [vmem:[%s4043_s9] sm:$0xff] %v1695_v9 }
 0x312   :  { %v2440_v10 = vpop.eup %2439 }
 0x313   :  { %v2442_v19 = vpop.eup %2441  ;;  %v1651_v20 = vadd.f32 1.0, %v2440_v10 }
 0x314   :  { %v2444_v11 = vpop.eup %2443  ;;  %v1653_v12 = vadd.f32 1.0, %v2442_v19 }
 0x315   :  { %v2446_v13 = vpop.eup %2445  ;;  %2447 = vrcp.f32 %v1651_v20  ;;  %v1652_v14 = vadd.f32 1.0, %v2444_v11 }
 0x316   :  { %2449 = vrcp.f32 %v1653_v12  ;;  %v1654_v17 = vadd.f32 1.0, %v2446_v13 }
 0x317   :  { %2451 = vrcp.f32 %v1652_v14 }
 0x318   :  { %2453 = vrcp.f32 %v1654_v17 }
 0x321   :  { %v1806_v18 = vpop.f32.mrf.mxu0 }
 0x322   :  { %v2448_v21 = vpop.eup %2447  ;;  %v1807_v52 = vadd.f32 %v2085_v3, %v1806_v18 }
 0x323   :  { %v2450_v22 = vpop.eup %2449  ;;  %v2417_v23 = vpop.f32.mrf.mxu0 }
 0x324   :  { %v2452_v1 = vpop.eup %2451  ;;  %1811 = vst.msk [vmem:[%s4044_s10] sm:$0x3] %vm1810_vm2, %v1807_v52 }
 0x325   :  { %v2454_v5 = vpop.eup %2453  ;;  %v1696_v48 = vcombine.low %v2448_v21, %v2452_v1 }
 0x326   :  { %v1697_v53 = vcombine.low %v2450_v22, %v2454_v5 }
 0x327   :  { %v1704_v24 = vrot.slane %v1696_v48, %v1686_v55 }
 0x328   :  { %v1711_v25 = vrot.slane %v1697_v53, %v1686_v55 }
 0x32a   :  { %v1712_v59 = vcombine.low %v1704_v24, %v1711_v25 }
 0x32c   :  { %1716 = vst [vmem:[%s4043_s9 + $0x8] sm:$0xff] %v1712_v59 }

</bundles_post_ra>
